<compile_context>
chip_gen: v7x
topology: tpu7x:2x2x1
jax: 0.10.0
libtpu: 0.0.40
codegen_flags: <defaults>
</compile_context>

<pallas_src>
import jax
import jax.numpy as jnp
from jax.experimental import pallas as pl
from jax.experimental.pallas import tpu as pltpu


# ----------------------------------------------------------------------------
# Fused kernel
# ----------------------------------------------------------------------------
def _make_fused_kernel(n_layers, B, T, H):
    """Builds the fused kernel for a fixed (n_layers, B, T, H)."""
    n_in = 3 + 3 * n_layers + 2   # x, h0, c0, [w_ih, w_hh, b] * L, fc_w, fc_b

    def kernel(*refs):
        x_ref, h0_ref, c0_ref = refs[0], refs[1], refs[2]
        layer_refs = refs[3:3 + 3 * n_layers]
        fc_w_ref, fc_b_ref = refs[n_in - 2], refs[n_in - 1]
        out_ref, hn_ref, cn_ref = refs[n_in], refs[n_in + 1], refs[n_in + 2]
        hseq_scr = refs[n_in + 3] if n_layers > 1 else None   # (T*B, H) VMEM

        D = x_ref.shape[-1]
        h = None

        for l in range(n_layers):
            w_ih_ref, w_hh_ref, b_ref = layer_refs[3 * l:3 * l + 3]
            w_hh = w_hh_ref[...]                       # (H, 4H), hoisted out of time loop

            # ---- Hoisted input projection + fused bias: one matmul per layer ----
            if l == 0:
                # (B, T, D) -> (B*T, D): row index = b*T + t (8-aligned, trivial relayout)
                xm = x_ref[...].reshape(B * T, D)
                gx = jnp.dot(xm, w_ih_ref[...],
                             preferred_element_type=jnp.float32) + b_ref[...]
                gx = gx.reshape(B, T, 4 * H)           # slice [:, t, :] per step
            else:
                # time-major (T*B, H) sequence produced by the previous layer (in VMEM)
                seq = hseq_scr[...]
                gx = jnp.dot(seq, w_ih_ref[...],
                             preferred_element_type=jnp.float32) + b_ref[...]

            h = h0_ref[l]                              # (B, H)
            c = c0_ref[l]                              # (B, H)
            write_seq = l < n_layers - 1               # last layer only needs final h

            # ---- Recurrence: fully unrolled, only the h @ W_hh matmul per step ----
            for t in range(T):
                if l == 0:
                    gxt = gx[:, t, :]                  # (B, 4H)
                else:
                    gxt = gx[t * B:(t + 1) * B, :]     # (B, 4H)
                gates = gxt + jnp.dot(h, w_hh, preferred_element_type=jnp.float32)
                # gate order [i | f | o | g]: one wide sigmoid + one tanh
                s = jax.nn.sigmoid(gates[:, :3 * H])
                g = jnp.tanh(gates[:, 3 * H:])
                c = s[:, H:2 * H] * c + s[:, :H] * g
                h = s[:, 2 * H:3 * H] * jnp.tanh(c)
                if write_seq:
                    hseq_scr[t * B:(t + 1) * B, :] = h   # stays in VMEM

            hn_ref[l] = h.astype(hn_ref.dtype)
            cn_ref[l] = c.astype(cn_ref.dtype)

        # ---- out = fc(relu(lstm_out[:, -1])); last layer's final h == out[:, -1] ----
        out_ref[...] = (jnp.dot(jnp.maximum(h, 0.0), fc_w_ref[...],
                                preferred_element_type=jnp.float32)
                        + fc_b_ref[...]).astype(out_ref.dtype)

    return kernel


# ----------------------------------------------------------------------------
# Wrapper
# ----------------------------------------------------------------------------
def lstm_net_forward(x, h, params):
    """Forward of LSTMNet.

    x: (B, T, input_dim) batch_first, float32
    h: tuple (h0, c0), each (n_layers, B, hidden_dim)
    params["lstm"][l] = (W_ih^T, W_hh^T, b_ih+b_hh) with gate columns in [i,f,o,g]
    params["fc_w_t"]: (H, O); params["fc_b"]: (1, O)
    returns: (out (B, output_dim), (h_n, c_n))
    """
    h0, c0 = h
    n_layers = h0.shape[0]
    B, T, _ = x.shape
    H = h0.shape[-1]
    O = params["fc_w_t"].shape[-1]

    flat_inputs = [x, h0, c0]
    for l in range(n_layers):
        flat_inputs.extend(params["lstm"][l])
    flat_inputs.extend([params["fc_w_t"], params["fc_b"]])

    scratch = [pltpu.VMEM((T * B, H), jnp.float32)] if n_layers > 1 else []

    out, h_n, c_n = pl.pallas_call(
        _make_fused_kernel(n_layers, B, T, H),
        out_shape=(
            jax.ShapeDtypeStruct((B, O), jnp.float32),
            jax.ShapeDtypeStruct((n_layers, B, H), jnp.float32),
            jax.ShapeDtypeStruct((n_layers, B, H), jnp.float32),
        ),
        scratch_shapes=scratch,
    )(*flat_inputs)
    return out, (h_n, c_n)


# ----------------------------------------------------------------------------
# Param prep helpers
# ----------------------------------------------------------------------------
def _reorder_ifgo_to_ifog(w_t, H):
    """Reorder gate blocks along the last axis from PyTorch [i,f,g,o] to [i,f,o,g]."""
    i = w_t[..., 0 * H:1 * H]
    f = w_t[..., 1 * H:2 * H]
    g = w_t[..., 2 * H:3 * H]
    o = w_t[..., 3 * H:4 * H]
    return jnp.concatenate([i, f, o, g], axis=-1)


# ----------------------------------------------------------------------------
# Pure-JAX reference (PyTorch gate order [i,f,g,o]) for correctness check
# ----------------------------------------------------------------------------
def lstm_net_ref(x, h, ref_params):
    h0, c0 = h
    n_layers = h0.shape[0]
    B, T, _ = x.shape
    layer_in = x
    h_finals, c_finals = [], []
    for layer in range(n_layers):
        w_ih_t, w_hh_t, bias = ref_params["lstm"][layer]
        H = w_hh_t.shape[0]
        hs, cs = h0[layer], c0[layer]
        outs = []
        for t in range(T):
            gates = layer_in[:, t] @ w_ih_t + hs @ w_hh_t + bias
            i = jax.nn.sigmoid(gates[:, 0 * H:1 * H])
            f = jax.nn.sigmoid(gates[:, 1 * H:2 * H])
            g = jnp.tanh(gates[:, 2 * H:3 * H])
            o = jax.nn.sigmoid(gates[:, 3 * H:4 * H])
            cs = f * cs + i * g
            hs = o * jnp.tanh(cs)
            outs.append(hs)
        layer_in = jnp.stack(outs, axis=1)
        h_finals.append(hs)
        c_finals.append(cs)
    out = jnp.maximum(layer_in[:, -1], 0.0) @ ref_params["fc_w_t"] + ref_params["fc_b"]
    return out, (jnp.stack(h_finals), jnp.stack(c_finals))


# ----------------------------------------------------------------------------
# Main
# ----------------------------------------------------------------------------
if __name__ == "__main__":
    B, T = 2, 8
    INPUT_DIM, HIDDEN_DIM, OUTPUT_DIM, N_LAYERS = 16, 32, 4, 2

    key = jax.random.PRNGKey(0)
    keys = jax.random.split(key, 4 * N_LAYERS + 5)

    scale = 1.0 / (HIDDEN_DIM ** 0.5)
    ref_params = {"lstm": []}    # PyTorch [i,f,g,o] gate order
    kern_params = {"lstm": []}   # reordered [i,f,o,g] gate order
    k_idx = 0
    for layer in range(N_LAYERS):
        d_in = INPUT_DIM if layer == 0 else HIDDEN_DIM
        w_ih = jax.random.uniform(keys[k_idx], (4 * HIDDEN_DIM, d_in),
                                  minval=-scale, maxval=scale, dtype=jnp.float32); k_idx += 1
        w_hh = jax.random.uniform(keys[k_idx], (4 * HIDDEN_DIM, HIDDEN_DIM),
                                  minval=-scale, maxval=scale, dtype=jnp.float32); k_idx += 1
        b_ih = jax.random.uniform(keys[k_idx], (4 * HIDDEN_DIM,),
                                  minval=-scale, maxval=scale, dtype=jnp.float32); k_idx += 1
        b_hh = jax.random.uniform(keys[k_idx], (4 * HIDDEN_DIM,),
                                  minval=-scale, maxval=scale, dtype=jnp.float32); k_idx += 1
        w_ih_t, w_hh_t = w_ih.T, w_hh.T
        bias = (b_ih + b_hh)[None, :]
        ref_params["lstm"].append((w_ih_t, w_hh_t, bias))
        kern_params["lstm"].append((
            _reorder_ifgo_to_ifog(w_ih_t, HIDDEN_DIM),
            _reorder_ifgo_to_ifog(w_hh_t, HIDDEN_DIM),
            _reorder_ifgo_to_ifog(bias, HIDDEN_DIM),
        ))

    fc_w = jax.random.uniform(keys[k_idx], (OUTPUT_DIM, HIDDEN_DIM),
                              minval=-scale, maxval=scale, dtype=jnp.float32); k_idx += 1
    fc_b = jax.random.uniform(keys[k_idx], (OUTPUT_DIM,),
                              minval=-scale, maxval=scale, dtype=jnp.float32); k_idx += 1
    for p in (ref_params, kern_params):
        p["fc_w_t"] = fc_w.T
        p["fc_b"] = fc_b[None, :]

    x = jax.random.normal(keys[k_idx], (B, T, INPUT_DIM), dtype=jnp.float32); k_idx += 1
    h0 = 0.1 * jax.random.normal(keys[k_idx], (N_LAYERS, B, HIDDEN_DIM), dtype=jnp.float32); k_idx += 1
    c0 = 0.1 * jax.random.normal(keys[k_idx], (N_LAYERS, B, HIDDEN_DIM), dtype=jnp.float32); k_idx += 1

    out, (h_n, c_n) = lstm_net_forward(x, (h0, c0), kern_params)
    jax.block_until_ready((out, h_n, c_n))

    # Correctness check vs pure-JAX reference (original PyTorch gate ordering).
    out_r, (h_r, c_r) = lstm_net_ref(x, (h0, c0), ref_params)
    assert out.shape == (B, OUTPUT_DIM)
    assert h_n.shape == (N_LAYERS, B, HIDDEN_DIM) and c_n.shape == (N_LAYERS, B, HIDDEN_DIM)
    assert jnp.allclose(out, out_r, atol=1e-5), "fc output mismatch"
    assert jnp.allclose(h_n, h_r, atol=1e-5), "h_n mismatch"
    assert jnp.allclose(c_n, c_r, atol=1e-5), "c_n mismatch"

    print("KERNEL_OK")
</pallas_src>

<mosaic_0001>
module attributes {stable_mosaic.version = 11 : i64} {
  func.func @kernel(%arg0: memref<2x8x16xf32, #tpu.memory_space<vmem>>, %arg1: memref<2x2x32xf32, #tpu.memory_space<vmem>>, %arg2: memref<2x2x32xf32, #tpu.memory_space<vmem>>, %arg3: memref<16x128xf32, #tpu.memory_space<vmem>>, %arg4: memref<32x128xf32, #tpu.memory_space<vmem>>, %arg5: memref<1x128xf32, #tpu.memory_space<vmem>>, %arg6: memref<32x128xf32, #tpu.memory_space<vmem>>, %arg7: memref<32x128xf32, #tpu.memory_space<vmem>>, %arg8: memref<1x128xf32, #tpu.memory_space<vmem>>, %arg9: memref<32x4xf32, #tpu.memory_space<vmem>>, %arg10: memref<1x4xf32, #tpu.memory_space<vmem>>, %arg11: memref<2x4xf32, #tpu.memory_space<vmem>>, %arg12: memref<2x2x32xf32, #tpu.memory_space<vmem>>, %arg13: memref<2x2x32xf32, #tpu.memory_space<vmem>>, %arg14: memref<16x32xf32, #tpu.memory_space<vmem>>) attributes {dimension_semantics = [], scalar_prefetch = 0 : i64, scratch_operands = 1 : i64, tpu.core_type = #tpu.core_type<tc>} {
    %c0 = arith.constant 0 : index
    %c0_0 = arith.constant 0 : index
    %0 = vector.load %arg4[%c0, %c0_0] : memref<32x128xf32, #tpu.memory_space<vmem>>, vector<32x128xf32>
    %c0_1 = arith.constant 0 : index
    %c0_2 = arith.constant 0 : index
    %c0_3 = arith.constant 0 : index
    %1 = vector.load %arg0[%c0_1, %c0_2, %c0_3] : memref<2x8x16xf32, #tpu.memory_space<vmem>>, vector<2x8x16xf32>
    %2 = vector.shape_cast %1 : vector<2x8x16xf32> to vector<16x16xf32>
    %c0_4 = arith.constant 0 : index
    %c0_5 = arith.constant 0 : index
    %3 = vector.load %arg3[%c0_4, %c0_5] : memref<16x128xf32, #tpu.memory_space<vmem>>, vector<16x128xf32>
    %cst = arith.constant dense<0.000000e+00> : vector<16x128xf32>
    %4 = tpu.matmul %2, %3, %cst {dimension_numbers = #tpu.dot_dimension_numbers<[1], [0], [0], [1], [0, 0, 1, 1], [], []>} : vector<16x16xf32>, vector<16x128xf32>, vector<16x128xf32> -> vector<16x128xf32>
    %c0_6 = arith.constant 0 : index
    %c0_7 = arith.constant 0 : index
    %5 = vector.load %arg5[%c0_6, %c0_7] : memref<1x128xf32, #tpu.memory_space<vmem>>, vector<1x128xf32>
    %6 = vector.broadcast %5 : vector<1x128xf32> to vector<16x128xf32>
    %7 = arith.addf %4, %6 : vector<16x128xf32>
    %8 = vector.shape_cast %7 : vector<16x128xf32> to vector<2x8x128xf32>
    %c0_8 = arith.constant 0 : index
    %c0_9 = arith.constant 0 : index
    %c0_10 = arith.constant 0 : index
    %9 = vector.load %arg1[%c0_8, %c0_9, %c0_10] : memref<2x2x32xf32, #tpu.memory_space<vmem>>, vector<1x2x32xf32>
    %10 = vector.shape_cast %9 : vector<1x2x32xf32> to vector<2x32xf32>
    %c0_11 = arith.constant 0 : index
    %c0_12 = arith.constant 0 : index
    %c0_13 = arith.constant 0 : index
    %11 = vector.load %arg2[%c0_11, %c0_12, %c0_13] : memref<2x2x32xf32, #tpu.memory_space<vmem>>, vector<1x2x32xf32>
    %12 = vector.shape_cast %11 : vector<1x2x32xf32> to vector<2x32xf32>
    %13 = vector.extract_strided_slice %8 {offsets = [0, 0, 0], sizes = [2, 1, 128], strides = [1, 1, 1]} : vector<2x8x128xf32> to vector<2x1x128xf32>
    %14 = vector.shape_cast %13 : vector<2x1x128xf32> to vector<2x128xf32>
    %cst_14 = arith.constant dense<0.000000e+00> : vector<2x128xf32>
    %15 = tpu.matmul %10, %0, %cst_14 {dimension_numbers = #tpu.dot_dimension_numbers<[1], [0], [0], [1], [0, 0, 1, 1], [], []>} : vector<2x32xf32>, vector<32x128xf32>, vector<2x128xf32> -> vector<2x128xf32>
    %16 = arith.addf %14, %15 : vector<2x128xf32>
    %17 = vector.extract_strided_slice %16 {offsets = [0, 0], sizes = [2, 96], strides = [1, 1]} : vector<2x128xf32> to vector<2x96xf32>
    %18 = arith.negf %17 : vector<2x96xf32>
    %19 = math.exp %18 : vector<2x96xf32>
    %cst_15 = arith.constant 1.000000e+00 : f32
    %20 = vector.broadcast %cst_15 : f32 to vector<2x96xf32>
    %21 = arith.addf %20, %19 : vector<2x96xf32>
    %22 = arith.divf %20, %21 : vector<2x96xf32>
    %23 = vector.extract_strided_slice %16 {offsets = [0, 96], sizes = [2, 32], strides = [1, 1]} : vector<2x128xf32> to vector<2x32xf32>
    %24 = math.tanh %23 : vector<2x32xf32>
    %25 = vector.extract_strided_slice %22 {offsets = [0, 32], sizes = [2, 32], strides = [1, 1]} : vector<2x96xf32> to vector<2x32xf32>
    %26 = arith.mulf %25, %12 : vector<2x32xf32>
    %27 = vector.extract_strided_slice %22 {offsets = [0, 0], sizes = [2, 32], strides = [1, 1]} : vector<2x96xf32> to vector<2x32xf32>
    %28 = arith.mulf %27, %24 : vector<2x32xf32>
    %29 = arith.addf %26, %28 : vector<2x32xf32>
    %30 = vector.extract_strided_slice %22 {offsets = [0, 64], sizes = [2, 32], strides = [1, 1]} : vector<2x96xf32> to vector<2x32xf32>
    %31 = math.tanh %29 : vector<2x32xf32>
    %32 = arith.mulf %30, %31 : vector<2x32xf32>
    %c0_16 = arith.constant 0 : index
    %c0_17 = arith.constant 0 : index
    %33 = vector.load %arg14[%c0_16, %c0_17] : memref<16x32xf32, #tpu.memory_space<vmem>>, vector<2x32xf32>
    tpu.vector_store %arg14[%c0_16, %c0_17], %32 {strides = array<i32>} : memref<16x32xf32, #tpu.memory_space<vmem>>, vector<2x32xf32>,
    %34 = vector.extract_strided_slice %8 {offsets = [0, 1, 0], sizes = [2, 1, 128], strides = [1, 1, 1]} : vector<2x8x128xf32> to vector<2x1x128xf32>
    %35 = vector.shape_cast %34 : vector<2x1x128xf32> to vector<2x128xf32>
    %cst_18 = arith.constant dense<0.000000e+00> : vector<2x128xf32>
    %36 = tpu.matmul %32, %0, %cst_18 {dimension_numbers = #tpu.dot_dimension_numbers<[1], [0], [0], [1], [0, 0, 1, 1], [], []>} : vector<2x32xf32>, vector<32x128xf32>, vector<2x128xf32> -> vector<2x128xf32>
    %37 = arith.addf %35, %36 : vector<2x128xf32>
    %38 = vector.extract_strided_slice %37 {offsets = [0, 0], sizes = [2, 96], strides = [1, 1]} : vector<2x128xf32> to vector<2x96xf32>
    %39 = arith.negf %38 : vector<2x96xf32>
    %40 = math.exp %39 : vector<2x96xf32>
    %cst_19 = arith.constant 1.000000e+00 : f32
    %41 = vector.broadcast %cst_19 : f32 to vector<2x96xf32>
    %42 = arith.addf %41, %40 : vector<2x96xf32>
    %43 = arith.divf %41, %42 : vector<2x96xf32>
    %44 = vector.extract_strided_slice %37 {offsets = [0, 96], sizes = [2, 32], strides = [1, 1]} : vector<2x128xf32> to vector<2x32xf32>
    %45 = math.tanh %44 : vector<2x32xf32>
    %46 = vector.extract_strided_slice %43 {offsets = [0, 32], sizes = [2, 32], strides = [1, 1]} : vector<2x96xf32> to vector<2x32xf32>
    %47 = arith.mulf %46, %29 : vector<2x32xf32>
    %48 = vector.extract_strided_slice %43 {offsets = [0, 0], sizes = [2, 32], strides = [1, 1]} : vector<2x96xf32> to vector<2x32xf32>
    %49 = arith.mulf %48, %45 : vector<2x32xf32>
    %50 = arith.addf %47, %49 : vector<2x32xf32>
    %51 = vector.extract_strided_slice %43 {offsets = [0, 64], sizes = [2, 32], strides = [1, 1]} : vector<2x96xf32> to vector<2x32xf32>
    %52 = math.tanh %50 : vector<2x32xf32>
    %53 = arith.mulf %51, %52 : vector<2x32xf32>
    %c2 = arith.constant 2 : index
    %c0_20 = arith.constant 0 : index
    %54 = vector.load %arg14[%c2, %c0_20] : memref<16x32xf32, #tpu.memory_space<vmem>>, vector<2x32xf32>
    tpu.vector_store %arg14[%c2, %c0_20], %53 {strides = array<i32>} : memref<16x32xf32, #tpu.memory_space<vmem>>, vector<2x32xf32>,
    %55 = vector.extract_strided_slice %8 {offsets = [0, 2, 0], sizes = [2, 1, 128], strides = [1, 1, 1]} : vector<2x8x128xf32> to vector<2x1x128xf32>
    %56 = vector.shape_cast %55 : vector<2x1x128xf32> to vector<2x128xf32>
    %cst_21 = arith.constant dense<0.000000e+00> : vector<2x128xf32>
    %57 = tpu.matmul %53, %0, %cst_21 {dimension_numbers = #tpu.dot_dimension_numbers<[1], [0], [0], [1], [0, 0, 1, 1], [], []>} : vector<2x32xf32>, vector<32x128xf32>, vector<2x128xf32> -> vector<2x128xf32>
    %58 = arith.addf %56, %57 : vector<2x128xf32>
    %59 = vector.extract_strided_slice %58 {offsets = [0, 0], sizes = [2, 96], strides = [1, 1]} : vector<2x128xf32> to vector<2x96xf32>
    %60 = arith.negf %59 : vector<2x96xf32>
    %61 = math.exp %60 : vector<2x96xf32>
    %cst_22 = arith.constant 1.000000e+00 : f32
    %62 = vector.broadcast %cst_22 : f32 to vector<2x96xf32>
    %63 = arith.addf %62, %61 : vector<2x96xf32>
    %64 = arith.divf %62, %63 : vector<2x96xf32>
    %65 = vector.extract_strided_slice %58 {offsets = [0, 96], sizes = [2, 32], strides = [1, 1]} : vector<2x128xf32> to vector<2x32xf32>
    %66 = math.tanh %65 : vector<2x32xf32>
    %67 = vector.extract_strided_slice %64 {offsets = [0, 32], sizes = [2, 32], strides = [1, 1]} : vector<2x96xf32> to vector<2x32xf32>
    %68 = arith.mulf %67, %50 : vector<2x32xf32>
    %69 = vector.extract_strided_slice %64 {offsets = [0, 0], sizes = [2, 32], strides = [1, 1]} : vector<2x96xf32> to vector<2x32xf32>
    %70 = arith.mulf %69, %66 : vector<2x32xf32>
    %71 = arith.addf %68, %70 : vector<2x32xf32>
    %72 = vector.extract_strided_slice %64 {offsets = [0, 64], sizes = [2, 32], strides = [1, 1]} : vector<2x96xf32> to vector<2x32xf32>
    %73 = math.tanh %71 : vector<2x32xf32>
    %74 = arith.mulf %72, %73 : vector<2x32xf32>
    %c4 = arith.constant 4 : index
    %c0_23 = arith.constant 0 : index
    %75 = vector.load %arg14[%c4, %c0_23] : memref<16x32xf32, #tpu.memory_space<vmem>>, vector<2x32xf32>
    tpu.vector_store %arg14[%c4, %c0_23], %74 {strides = array<i32>} : memref<16x32xf32, #tpu.memory_space<vmem>>, vector<2x32xf32>,
    %76 = vector.extract_strided_slice %8 {offsets = [0, 3, 0], sizes = [2, 1, 128], strides = [1, 1, 1]} : vector<2x8x128xf32> to vector<2x1x128xf32>
    %77 = vector.shape_cast %76 : vector<2x1x128xf32> to vector<2x128xf32>
    %cst_24 = arith.constant dense<0.000000e+00> : vector<2x128xf32>
    %78 = tpu.matmul %74, %0, %cst_24 {dimension_numbers = #tpu.dot_dimension_numbers<[1], [0], [0], [1], [0, 0, 1, 1], [], []>} : vector<2x32xf32>, vector<32x128xf32>, vector<2x128xf32> -> vector<2x128xf32>
    %79 = arith.addf %77, %78 : vector<2x128xf32>
    %80 = vector.extract_strided_slice %79 {offsets = [0, 0], sizes = [2, 96], strides = [1, 1]} : vector<2x128xf32> to vector<2x96xf32>
    %81 = arith.negf %80 : vector<2x96xf32>
    %82 = math.exp %81 : vector<2x96xf32>
    %cst_25 = arith.constant 1.000000e+00 : f32
    %83 = vector.broadcast %cst_25 : f32 to vector<2x96xf32>
    %84 = arith.addf %83, %82 : vector<2x96xf32>
    %85 = arith.divf %83, %84 : vector<2x96xf32>
    %86 = vector.extract_strided_slice %79 {offsets = [0, 96], sizes = [2, 32], strides = [1, 1]} : vector<2x128xf32> to vector<2x32xf32>
    %87 = math.tanh %86 : vector<2x32xf32>
    %88 = vector.extract_strided_slice %85 {offsets = [0, 32], sizes = [2, 32], strides = [1, 1]} : vector<2x96xf32> to vector<2x32xf32>
    %89 = arith.mulf %88, %71 : vector<2x32xf32>
    %90 = vector.extract_strided_slice %85 {offsets = [0, 0], sizes = [2, 32], strides = [1, 1]} : vector<2x96xf32> to vector<2x32xf32>
    %91 = arith.mulf %90, %87 : vector<2x32xf32>
    %92 = arith.addf %89, %91 : vector<2x32xf32>
    %93 = vector.extract_strided_slice %85 {offsets = [0, 64], sizes = [2, 32], strides = [1, 1]} : vector<2x96xf32> to vector<2x32xf32>
    %94 = math.tanh %92 : vector<2x32xf32>
    %95 = arith.mulf %93, %94 : vector<2x32xf32>
    %c6 = arith.constant 6 : index
    %c0_26 = arith.constant 0 : index
    %96 = vector.load %arg14[%c6, %c0_26] : memref<16x32xf32, #tpu.memory_space<vmem>>, vector<2x32xf32>
    tpu.vector_store %arg14[%c6, %c0_26], %95 {strides = array<i32>} : memref<16x32xf32, #tpu.memory_space<vmem>>, vector<2x32xf32>,
    %97 = vector.extract_strided_slice %8 {offsets = [0, 4, 0], sizes = [2, 1, 128], strides = [1, 1, 1]} : vector<2x8x128xf32> to vector<2x1x128xf32>
    %98 = vector.shape_cast %97 : vector<2x1x128xf32> to vector<2x128xf32>
    %cst_27 = arith.constant dense<0.000000e+00> : vector<2x128xf32>
    %99 = tpu.matmul %95, %0, %cst_27 {dimension_numbers = #tpu.dot_dimension_numbers<[1], [0], [0], [1], [0, 0, 1, 1], [], []>} : vector<2x32xf32>, vector<32x128xf32>, vector<2x128xf32> -> vector<2x128xf32>
    %100 = arith.addf %98, %99 : vector<2x128xf32>
    %101 = vector.extract_strided_slice %100 {offsets = [0, 0], sizes = [2, 96], strides = [1, 1]} : vector<2x128xf32> to vector<2x96xf32>
    %102 = arith.negf %101 : vector<2x96xf32>
    %103 = math.exp %102 : vector<2x96xf32>
    %cst_28 = arith.constant 1.000000e+00 : f32
    %104 = vector.broadcast %cst_28 : f32 to vector<2x96xf32>
    %105 = arith.addf %104, %103 : vector<2x96xf32>
    %106 = arith.divf %104, %105 : vector<2x96xf32>
    %107 = vector.extract_strided_slice %100 {offsets = [0, 96], sizes = [2, 32], strides = [1, 1]} : vector<2x128xf32> to vector<2x32xf32>
    %108 = math.tanh %107 : vector<2x32xf32>
    %109 = vector.extract_strided_slice %106 {offsets = [0, 32], sizes = [2, 32], strides = [1, 1]} : vector<2x96xf32> to vector<2x32xf32>
    %110 = arith.mulf %109, %92 : vector<2x32xf32>
    %111 = vector.extract_strided_slice %106 {offsets = [0, 0], sizes = [2, 32], strides = [1, 1]} : vector<2x96xf32> to vector<2x32xf32>
    %112 = arith.mulf %111, %108 : vector<2x32xf32>
    %113 = arith.addf %110, %112 : vector<2x32xf32>
    %114 = vector.extract_strided_slice %106 {offsets = [0, 64], sizes = [2, 32], strides = [1, 1]} : vector<2x96xf32> to vector<2x32xf32>
    %115 = math.tanh %113 : vector<2x32xf32>
    %116 = arith.mulf %114, %115 : vector<2x32xf32>
    %c8 = arith.constant 8 : index
    %c0_29 = arith.constant 0 : index
    %117 = vector.load %arg14[%c8, %c0_29] : memref<16x32xf32, #tpu.memory_space<vmem>>, vector<2x32xf32>
    tpu.vector_store %arg14[%c8, %c0_29], %116 {strides = array<i32>} : memref<16x32xf32, #tpu.memory_space<vmem>>, vector<2x32xf32>,
    %118 = vector.extract_strided_slice %8 {offsets = [0, 5, 0], sizes = [2, 1, 128], strides = [1, 1, 1]} : vector<2x8x128xf32> to vector<2x1x128xf32>
    %119 = vector.shape_cast %118 : vector<2x1x128xf32> to vector<2x128xf32>
    %cst_30 = arith.constant dense<0.000000e+00> : vector<2x128xf32>
    %120 = tpu.matmul %116, %0, %cst_30 {dimension_numbers = #tpu.dot_dimension_numbers<[1], [0], [0], [1], [0, 0, 1, 1], [], []>} : vector<2x32xf32>, vector<32x128xf32>, vector<2x128xf32> -> vector<2x128xf32>
    %121 = arith.addf %119, %120 : vector<2x128xf32>
    %122 = vector.extract_strided_slice %121 {offsets = [0, 0], sizes = [2, 96], strides = [1, 1]} : vector<2x128xf32> to vector<2x96xf32>
    %123 = arith.negf %122 : vector<2x96xf32>
    %124 = math.exp %123 : vector<2x96xf32>
    %cst_31 = arith.constant 1.000000e+00 : f32
    %125 = vector.broadcast %cst_31 : f32 to vector<2x96xf32>
    %126 = arith.addf %125, %124 : vector<2x96xf32>
    %127 = arith.divf %125, %126 : vector<2x96xf32>
    %128 = vector.extract_strided_slice %121 {offsets = [0, 96], sizes = [2, 32], strides = [1, 1]} : vector<2x128xf32> to vector<2x32xf32>
    %129 = math.tanh %128 : vector<2x32xf32>
    %130 = vector.extract_strided_slice %127 {offsets = [0, 32], sizes = [2, 32], strides = [1, 1]} : vector<2x96xf32> to vector<2x32xf32>
    %131 = arith.mulf %130, %113 : vector<2x32xf32>
    %132 = vector.extract_strided_slice %127 {offsets = [0, 0], sizes = [2, 32], strides = [1, 1]} : vector<2x96xf32> to vector<2x32xf32>
    %133 = arith.mulf %132, %129 : vector<2x32xf32>
    %134 = arith.addf %131, %133 : vector<2x32xf32>
    %135 = vector.extract_strided_slice %127 {offsets = [0, 64], sizes = [2, 32], strides = [1, 1]} : vector<2x96xf32> to vector<2x32xf32>
    %136 = math.tanh %134 : vector<2x32xf32>
    %137 = arith.mulf %135, %136 : vector<2x32xf32>
    %c10 = arith.constant 10 : index
    %c0_32 = arith.constant 0 : index
    %138 = vector.load %arg14[%c10, %c0_32] : memref<16x32xf32, #tpu.memory_space<vmem>>, vector<2x32xf32>
    tpu.vector_store %arg14[%c10, %c0_32], %137 {strides = array<i32>} : memref<16x32xf32, #tpu.memory_space<vmem>>, vector<2x32xf32>,
    %139 = vector.extract_strided_slice %8 {offsets = [0, 6, 0], sizes = [2, 1, 128], strides = [1, 1, 1]} : vector<2x8x128xf32> to vector<2x1x128xf32>
    %140 = vector.shape_cast %139 : vector<2x1x128xf32> to vector<2x128xf32>
    %cst_33 = arith.constant dense<0.000000e+00> : vector<2x128xf32>
    %141 = tpu.matmul %137, %0, %cst_33 {dimension_numbers = #tpu.dot_dimension_numbers<[1], [0], [0], [1], [0, 0, 1, 1], [], []>} : vector<2x32xf32>, vector<32x128xf32>, vector<2x128xf32> -> vector<2x128xf32>
    %142 = arith.addf %140, %141 : vector<2x128xf32>
    %143 = vector.extract_strided_slice %142 {offsets = [0, 0], sizes = [2, 96], strides = [1, 1]} : vector<2x128xf32> to vector<2x96xf32>
    %144 = arith.negf %143 : vector<2x96xf32>
    %145 = math.exp %144 : vector<2x96xf32>
    %cst_34 = arith.constant 1.000000e+00 : f32
    %146 = vector.broadcast %cst_34 : f32 to vector<2x96xf32>
    %147 = arith.addf %146, %145 : vector<2x96xf32>
    %148 = arith.divf %146, %147 : vector<2x96xf32>
    %149 = vector.extract_strided_slice %142 {offsets = [0, 96], sizes = [2, 32], strides = [1, 1]} : vector<2x128xf32> to vector<2x32xf32>
    %150 = math.tanh %149 : vector<2x32xf32>
    %151 = vector.extract_strided_slice %148 {offsets = [0, 32], sizes = [2, 32], strides = [1, 1]} : vector<2x96xf32> to vector<2x32xf32>
    %152 = arith.mulf %151, %134 : vector<2x32xf32>
    %153 = vector.extract_strided_slice %148 {offsets = [0, 0], sizes = [2, 32], strides = [1, 1]} : vector<2x96xf32> to vector<2x32xf32>
    %154 = arith.mulf %153, %150 : vector<2x32xf32>
    %155 = arith.addf %152, %154 : vector<2x32xf32>
    %156 = vector.extract_strided_slice %148 {offsets = [0, 64], sizes = [2, 32], strides = [1, 1]} : vector<2x96xf32> to vector<2x32xf32>
    %157 = math.tanh %155 : vector<2x32xf32>
    %158 = arith.mulf %156, %157 : vector<2x32xf32>
    %c12 = arith.constant 12 : index
    %c0_35 = arith.constant 0 : index
    %159 = vector.load %arg14[%c12, %c0_35] : memref<16x32xf32, #tpu.memory_space<vmem>>, vector<2x32xf32>
    tpu.vector_store %arg14[%c12, %c0_35], %158 {strides = array<i32>} : memref<16x32xf32, #tpu.memory_space<vmem>>, vector<2x32xf32>,
    %160 = vector.extract_strided_slice %8 {offsets = [0, 7, 0], sizes = [2, 1, 128], strides = [1, 1, 1]} : vector<2x8x128xf32> to vector<2x1x128xf32>
    %161 = vector.shape_cast %160 : vector<2x1x128xf32> to vector<2x128xf32>
    %cst_36 = arith.constant dense<0.000000e+00> : vector<2x128xf32>
    %162 = tpu.matmul %158, %0, %cst_36 {dimension_numbers = #tpu.dot_dimension_numbers<[1], [0], [0], [1], [0, 0, 1, 1], [], []>} : vector<2x32xf32>, vector<32x128xf32>, vector<2x128xf32> -> vector<2x128xf32>
    %163 = arith.addf %161, %162 : vector<2x128xf32>
    %164 = vector.extract_strided_slice %163 {offsets = [0, 0], sizes = [2, 96], strides = [1, 1]} : vector<2x128xf32> to vector<2x96xf32>
    %165 = arith.negf %164 : vector<2x96xf32>
    %166 = math.exp %165 : vector<2x96xf32>
    %cst_37 = arith.constant 1.000000e+00 : f32
    %167 = vector.broadcast %cst_37 : f32 to vector<2x96xf32>
    %168 = arith.addf %167, %166 : vector<2x96xf32>
    %169 = arith.divf %167, %168 : vector<2x96xf32>
    %170 = vector.extract_strided_slice %163 {offsets = [0, 96], sizes = [2, 32], strides = [1, 1]} : vector<2x128xf32> to vector<2x32xf32>
    %171 = math.tanh %170 : vector<2x32xf32>
    %172 = vector.extract_strided_slice %169 {offsets = [0, 32], sizes = [2, 32], strides = [1, 1]} : vector<2x96xf32> to vector<2x32xf32>
    %173 = arith.mulf %172, %155 : vector<2x32xf32>
    %174 = vector.extract_strided_slice %169 {offsets = [0, 0], sizes = [2, 32], strides = [1, 1]} : vector<2x96xf32> to vector<2x32xf32>
    %175 = arith.mulf %174, %171 : vector<2x32xf32>
    %176 = arith.addf %173, %175 : vector<2x32xf32>
    %177 = vector.extract_strided_slice %169 {offsets = [0, 64], sizes = [2, 32], strides = [1, 1]} : vector<2x96xf32> to vector<2x32xf32>
    %178 = math.tanh %176 : vector<2x32xf32>
    %179 = arith.mulf %177, %178 : vector<2x32xf32>
    %c14 = arith.constant 14 : index
    %c0_38 = arith.constant 0 : index
    %180 = vector.load %arg14[%c14, %c0_38] : memref<16x32xf32, #tpu.memory_space<vmem>>, vector<2x32xf32>
    tpu.vector_store %arg14[%c14, %c0_38], %179 {strides = array<i32>} : memref<16x32xf32, #tpu.memory_space<vmem>>, vector<2x32xf32>,
    %c0_39 = arith.constant 0 : index
    %c0_40 = arith.constant 0 : index
    %c0_41 = arith.constant 0 : index
    %181 = vector.load %arg12[%c0_39, %c0_40, %c0_41] : memref<2x2x32xf32, #tpu.memory_space<vmem>>, vector<1x2x32xf32>
    %182 = vector.shape_cast %181 : vector<1x2x32xf32> to vector<2x32xf32>
    %183 = vector.shape_cast %179 : vector<2x32xf32> to vector<1x2x32xf32>
    tpu.vector_store %arg12[%c0_39, %c0_40, %c0_41], %183 {strides = array<i32>} : memref<2x2x32xf32, #tpu.memory_space<vmem>>, vector<1x2x32xf32>,
    %c0_42 = arith.constant 0 : index
    %c0_43 = arith.constant 0 : index
    %c0_44 = arith.constant 0 : index
    %184 = vector.load %arg13[%c0_42, %c0_43, %c0_44] : memref<2x2x32xf32, #tpu.memory_space<vmem>>, vector<1x2x32xf32>
    %185 = vector.shape_cast %184 : vector<1x2x32xf32> to vector<2x32xf32>
    %186 = vector.shape_cast %176 : vector<2x32xf32> to vector<1x2x32xf32>
    tpu.vector_store %arg13[%c0_42, %c0_43, %c0_44], %186 {strides = array<i32>} : memref<2x2x32xf32, #tpu.memory_space<vmem>>, vector<1x2x32xf32>,
    %c0_45 = arith.constant 0 : index
    %c0_46 = arith.constant 0 : index
    %187 = vector.load %arg7[%c0_45, %c0_46] : memref<32x128xf32, #tpu.memory_space<vmem>>, vector<32x128xf32>
    %c0_47 = arith.constant 0 : index
    %c0_48 = arith.constant 0 : index
    %188 = vector.load %arg14[%c0_47, %c0_48] : memref<16x32xf32, #tpu.memory_space<vmem>>, vector<16x32xf32>
    %c0_49 = arith.constant 0 : index
    %c0_50 = arith.constant 0 : index
    %189 = vector.load %arg6[%c0_49, %c0_50] : memref<32x128xf32, #tpu.memory_space<vmem>>, vector<32x128xf32>
    %cst_51 = arith.constant dense<0.000000e+00> : vector<16x128xf32>
    %190 = tpu.matmul %188, %189, %cst_51 {dimension_numbers = #tpu.dot_dimension_numbers<[1], [0], [0], [1], [0, 0, 1, 1], [], []>} : vector<16x32xf32>, vector<32x128xf32>, vector<16x128xf32> -> vector<16x128xf32>
    %c0_52 = arith.constant 0 : index
    %c0_53 = arith.constant 0 : index
    %191 = vector.load %arg8[%c0_52, %c0_53] : memref<1x128xf32, #tpu.memory_space<vmem>>, vector<1x128xf32>
    %192 = vector.broadcast %191 : vector<1x128xf32> to vector<16x128xf32>
    %193 = arith.addf %190, %192 : vector<16x128xf32>
    %c1 = arith.constant 1 : index
    %c0_54 = arith.constant 0 : index
    %c0_55 = arith.constant 0 : index
    %194 = vector.load %arg1[%c1, %c0_54, %c0_55] : memref<2x2x32xf32, #tpu.memory_space<vmem>>, vector<1x2x32xf32>
    %195 = vector.shape_cast %194 : vector<1x2x32xf32> to vector<2x32xf32>
    %c1_56 = arith.constant 1 : index
    %c0_57 = arith.constant 0 : index
    %c0_58 = arith.constant 0 : index
    %196 = vector.load %arg2[%c1_56, %c0_57, %c0_58] : memref<2x2x32xf32, #tpu.memory_space<vmem>>, vector<1x2x32xf32>
    %197 = vector.shape_cast %196 : vector<1x2x32xf32> to vector<2x32xf32>
    %198 = vector.extract_strided_slice %193 {offsets = [0, 0], sizes = [2, 128], strides = [1, 1]} : vector<16x128xf32> to vector<2x128xf32>
    %cst_59 = arith.constant dense<0.000000e+00> : vector<2x128xf32>
    %199 = tpu.matmul %195, %187, %cst_59 {dimension_numbers = #tpu.dot_dimension_numbers<[1], [0], [0], [1], [0, 0, 1, 1], [], []>} : vector<2x32xf32>, vector<32x128xf32>, vector<2x128xf32> -> vector<2x128xf32>
    %200 = arith.addf %198, %199 : vector<2x128xf32>
    %201 = vector.extract_strided_slice %200 {offsets = [0, 0], sizes = [2, 96], strides = [1, 1]} : vector<2x128xf32> to vector<2x96xf32>
    %202 = arith.negf %201 : vector<2x96xf32>
    %203 = math.exp %202 : vector<2x96xf32>
    %cst_60 = arith.constant 1.000000e+00 : f32
    %204 = vector.broadcast %cst_60 : f32 to vector<2x96xf32>
    %205 = arith.addf %204, %203 : vector<2x96xf32>
    %206 = arith.divf %204, %205 : vector<2x96xf32>
    %207 = vector.extract_strided_slice %200 {offsets = [0, 96], sizes = [2, 32], strides = [1, 1]} : vector<2x128xf32> to vector<2x32xf32>
    %208 = math.tanh %207 : vector<2x32xf32>
    %209 = vector.extract_strided_slice %206 {offsets = [0, 32], sizes = [2, 32], strides = [1, 1]} : vector<2x96xf32> to vector<2x32xf32>
    %210 = arith.mulf %209, %197 : vector<2x32xf32>
    %211 = vector.extract_strided_slice %206 {offsets = [0, 0], sizes = [2, 32], strides = [1, 1]} : vector<2x96xf32> to vector<2x32xf32>
    %212 = arith.mulf %211, %208 : vector<2x32xf32>
    %213 = arith.addf %210, %212 : vector<2x32xf32>
    %214 = vector.extract_strided_slice %206 {offsets = [0, 64], sizes = [2, 32], strides = [1, 1]} : vector<2x96xf32> to vector<2x32xf32>
    %215 = math.tanh %213 : vector<2x32xf32>
    %216 = arith.mulf %214, %215 : vector<2x32xf32>
    %217 = vector.extract_strided_slice %193 {offsets = [2, 0], sizes = [2, 128], strides = [1, 1]} : vector<16x128xf32> to vector<2x128xf32>
    %cst_61 = arith.constant dense<0.000000e+00> : vector<2x128xf32>
    %218 = tpu.matmul %216, %187, %cst_61 {dimension_numbers = #tpu.dot_dimension_numbers<[1], [0], [0], [1], [0, 0, 1, 1], [], []>} : vector<2x32xf32>, vector<32x128xf32>, vector<2x128xf32> -> vector<2x128xf32>
    %219 = arith.addf %217, %218 : vector<2x128xf32>
    %220 = vector.extract_strided_slice %219 {offsets = [0, 0], sizes = [2, 96], strides = [1, 1]} : vector<2x128xf32> to vector<2x96xf32>
    %221 = arith.negf %220 : vector<2x96xf32>
    %222 = math.exp %221 : vector<2x96xf32>
    %cst_62 = arith.constant 1.000000e+00 : f32
    %223 = vector.broadcast %cst_62 : f32 to vector<2x96xf32>
    %224 = arith.addf %223, %222 : vector<2x96xf32>
    %225 = arith.divf %223, %224 : vector<2x96xf32>
    %226 = vector.extract_strided_slice %219 {offsets = [0, 96], sizes = [2, 32], strides = [1, 1]} : vector<2x128xf32> to vector<2x32xf32>
    %227 = math.tanh %226 : vector<2x32xf32>
    %228 = vector.extract_strided_slice %225 {offsets = [0, 32], sizes = [2, 32], strides = [1, 1]} : vector<2x96xf32> to vector<2x32xf32>
    %229 = arith.mulf %228, %213 : vector<2x32xf32>
    %230 = vector.extract_strided_slice %225 {offsets = [0, 0], sizes = [2, 32], strides = [1, 1]} : vector<2x96xf32> to vector<2x32xf32>
    %231 = arith.mulf %230, %227 : vector<2x32xf32>
    %232 = arith.addf %229, %231 : vector<2x32xf32>
    %233 = vector.extract_strided_slice %225 {offsets = [0, 64], sizes = [2, 32], strides = [1, 1]} : vector<2x96xf32> to vector<2x32xf32>
    %234 = math.tanh %232 : vector<2x32xf32>
    %235 = arith.mulf %233, %234 : vector<2x32xf32>
    %236 = vector.extract_strided_slice %193 {offsets = [4, 0], sizes = [2, 128], strides = [1, 1]} : vector<16x128xf32> to vector<2x128xf32>
    %cst_63 = arith.constant dense<0.000000e+00> : vector<2x128xf32>
    %237 = tpu.matmul %235, %187, %cst_63 {dimension_numbers = #tpu.dot_dimension_numbers<[1], [0], [0], [1], [0, 0, 1, 1], [], []>} : vector<2x32xf32>, vector<32x128xf32>, vector<2x128xf32> -> vector<2x128xf32>
    %238 = arith.addf %236, %237 : vector<2x128xf32>
    %239 = vector.extract_strided_slice %238 {offsets = [0, 0], sizes = [2, 96], strides = [1, 1]} : vector<2x128xf32> to vector<2x96xf32>
    %240 = arith.negf %239 : vector<2x96xf32>
    %241 = math.exp %240 : vector<2x96xf32>
    %cst_64 = arith.constant 1.000000e+00 : f32
    %242 = vector.broadcast %cst_64 : f32 to vector<2x96xf32>
    %243 = arith.addf %242, %241 : vector<2x96xf32>
    %244 = arith.divf %242, %243 : vector<2x96xf32>
    %245 = vector.extract_strided_slice %238 {offsets = [0, 96], sizes = [2, 32], strides = [1, 1]} : vector<2x128xf32> to vector<2x32xf32>
    %246 = math.tanh %245 : vector<2x32xf32>
    %247 = vector.extract_strided_slice %244 {offsets = [0, 32], sizes = [2, 32], strides = [1, 1]} : vector<2x96xf32> to vector<2x32xf32>
    %248 = arith.mulf %247, %232 : vector<2x32xf32>
    %249 = vector.extract_strided_slice %244 {offsets = [0, 0], sizes = [2, 32], strides = [1, 1]} : vector<2x96xf32> to vector<2x32xf32>
    %250 = arith.mulf %249, %246 : vector<2x32xf32>
    %251 = arith.addf %248, %250 : vector<2x32xf32>
    %252 = vector.extract_strided_slice %244 {offsets = [0, 64], sizes = [2, 32], strides = [1, 1]} : vector<2x96xf32> to vector<2x32xf32>
    %253 = math.tanh %251 : vector<2x32xf32>
    %254 = arith.mulf %252, %253 : vector<2x32xf32>
    %255 = vector.extract_strided_slice %193 {offsets = [6, 0], sizes = [2, 128], strides = [1, 1]} : vector<16x128xf32> to vector<2x128xf32>
    %cst_65 = arith.constant dense<0.000000e+00> : vector<2x128xf32>
    %256 = tpu.matmul %254, %187, %cst_65 {dimension_numbers = #tpu.dot_dimension_numbers<[1], [0], [0], [1], [0, 0, 1, 1], [], []>} : vector<2x32xf32>, vector<32x128xf32>, vector<2x128xf32> -> vector<2x128xf32>
    %257 = arith.addf %255, %256 : vector<2x128xf32>
    %258 = vector.extract_strided_slice %257 {offsets = [0, 0], sizes = [2, 96], strides = [1, 1]} : vector<2x128xf32> to vector<2x96xf32>
    %259 = arith.negf %258 : vector<2x96xf32>
    %260 = math.exp %259 : vector<2x96xf32>
    %cst_66 = arith.constant 1.000000e+00 : f32
    %261 = vector.broadcast %cst_66 : f32 to vector<2x96xf32>
    %262 = arith.addf %261, %260 : vector<2x96xf32>
    %263 = arith.divf %261, %262 : vector<2x96xf32>
    %264 = vector.extract_strided_slice %257 {offsets = [0, 96], sizes = [2, 32], strides = [1, 1]} : vector<2x128xf32> to vector<2x32xf32>
    %265 = math.tanh %264 : vector<2x32xf32>
    %266 = vector.extract_strided_slice %263 {offsets = [0, 32], sizes = [2, 32], strides = [1, 1]} : vector<2x96xf32> to vector<2x32xf32>
    %267 = arith.mulf %266, %251 : vector<2x32xf32>
    %268 = vector.extract_strided_slice %263 {offsets = [0, 0], sizes = [2, 32], strides = [1, 1]} : vector<2x96xf32> to vector<2x32xf32>
    %269 = arith.mulf %268, %265 : vector<2x32xf32>
    %270 = arith.addf %267, %269 : vector<2x32xf32>
    %271 = vector.extract_strided_slice %263 {offsets = [0, 64], sizes = [2, 32], strides = [1, 1]} : vector<2x96xf32> to vector<2x32xf32>
    %272 = math.tanh %270 : vector<2x32xf32>
    %273 = arith.mulf %271, %272 : vector<2x32xf32>
    %274 = vector.extract_strided_slice %193 {offsets = [8, 0], sizes = [2, 128], strides = [1, 1]} : vector<16x128xf32> to vector<2x128xf32>
    %cst_67 = arith.constant dense<0.000000e+00> : vector<2x128xf32>
    %275 = tpu.matmul %273, %187, %cst_67 {dimension_numbers = #tpu.dot_dimension_numbers<[1], [0], [0], [1], [0, 0, 1, 1], [], []>} : vector<2x32xf32>, vector<32x128xf32>, vector<2x128xf32> -> vector<2x128xf32>
    %276 = arith.addf %274, %275 : vector<2x128xf32>
    %277 = vector.extract_strided_slice %276 {offsets = [0, 0], sizes = [2, 96], strides = [1, 1]} : vector<2x128xf32> to vector<2x96xf32>
    %278 = arith.negf %277 : vector<2x96xf32>
    %279 = math.exp %278 : vector<2x96xf32>
    %cst_68 = arith.constant 1.000000e+00 : f32
    %280 = vector.broadcast %cst_68 : f32 to vector<2x96xf32>
    %281 = arith.addf %280, %279 : vector<2x96xf32>
    %282 = arith.divf %280, %281 : vector<2x96xf32>
    %283 = vector.extract_strided_slice %276 {offsets = [0, 96], sizes = [2, 32], strides = [1, 1]} : vector<2x128xf32> to vector<2x32xf32>
    %284 = math.tanh %283 : vector<2x32xf32>
    %285 = vector.extract_strided_slice %282 {offsets = [0, 32], sizes = [2, 32], strides = [1, 1]} : vector<2x96xf32> to vector<2x32xf32>
    %286 = arith.mulf %285, %270 : vector<2x32xf32>
    %287 = vector.extract_strided_slice %282 {offsets = [0, 0], sizes = [2, 32], strides = [1, 1]} : vector<2x96xf32> to vector<2x32xf32>
    %288 = arith.mulf %287, %284 : vector<2x32xf32>
    %289 = arith.addf %286, %288 : vector<2x32xf32>
    %290 = vector.extract_strided_slice %282 {offsets = [0, 64], sizes = [2, 32], strides = [1, 1]} : vector<2x96xf32> to vector<2x32xf32>
    %291 = math.tanh %289 : vector<2x32xf32>
    %292 = arith.mulf %290, %291 : vector<2x32xf32>
    %293 = vector.extract_strided_slice %193 {offsets = [10, 0], sizes = [2, 128], strides = [1, 1]} : vector<16x128xf32> to vector<2x128xf32>
    %cst_69 = arith.constant dense<0.000000e+00> : vector<2x128xf32>
    %294 = tpu.matmul %292, %187, %cst_69 {dimension_numbers = #tpu.dot_dimension_numbers<[1], [0], [0], [1], [0, 0, 1, 1], [], []>} : vector<2x32xf32>, vector<32x128xf32>, vector<2x128xf32> -> vector<2x128xf32>
    %295 = arith.addf %293, %294 : vector<2x128xf32>
    %296 = vector.extract_strided_slice %295 {offsets = [0, 0], sizes = [2, 96], strides = [1, 1]} : vector<2x128xf32> to vector<2x96xf32>
    %297 = arith.negf %296 : vector<2x96xf32>
    %298 = math.exp %297 : vector<2x96xf32>
    %cst_70 = arith.constant 1.000000e+00 : f32
    %299 = vector.broadcast %cst_70 : f32 to vector<2x96xf32>
    %300 = arith.addf %299, %298 : vector<2x96xf32>
    %301 = arith.divf %299, %300 : vector<2x96xf32>
    %302 = vector.extract_strided_slice %295 {offsets = [0, 96], sizes = [2, 32], strides = [1, 1]} : vector<2x128xf32> to vector<2x32xf32>
    %303 = math.tanh %302 : vector<2x32xf32>
    %304 = vector.extract_strided_slice %301 {offsets = [0, 32], sizes = [2, 32], strides = [1, 1]} : vector<2x96xf32> to vector<2x32xf32>
    %305 = arith.mulf %304, %289 : vector<2x32xf32>
    %306 = vector.extract_strided_slice %301 {offsets = [0, 0], sizes = [2, 32], strides = [1, 1]} : vector<2x96xf32> to vector<2x32xf32>
    %307 = arith.mulf %306, %303 : vector<2x32xf32>
    %308 = arith.addf %305, %307 : vector<2x32xf32>
    %309 = vector.extract_strided_slice %301 {offsets = [0, 64], sizes = [2, 32], strides = [1, 1]} : vector<2x96xf32> to vector<2x32xf32>
    %310 = math.tanh %308 : vector<2x32xf32>
    %311 = arith.mulf %309, %310 : vector<2x32xf32>
    %312 = vector.extract_strided_slice %193 {offsets = [12, 0], sizes = [2, 128], strides = [1, 1]} : vector<16x128xf32> to vector<2x128xf32>
    %cst_71 = arith.constant dense<0.000000e+00> : vector<2x128xf32>
    %313 = tpu.matmul %311, %187, %cst_71 {dimension_numbers = #tpu.dot_dimension_numbers<[1], [0], [0], [1], [0, 0, 1, 1], [], []>} : vector<2x32xf32>, vector<32x128xf32>, vector<2x128xf32> -> vector<2x128xf32>
    %314 = arith.addf %312, %313 : vector<2x128xf32>
    %315 = vector.extract_strided_slice %314 {offsets = [0, 0], sizes = [2, 96], strides = [1, 1]} : vector<2x128xf32> to vector<2x96xf32>
    %316 = arith.negf %315 : vector<2x96xf32>
    %317 = math.exp %316 : vector<2x96xf32>
    %cst_72 = arith.constant 1.000000e+00 : f32
    %318 = vector.broadcast %cst_72 : f32 to vector<2x96xf32>
    %319 = arith.addf %318, %317 : vector<2x96xf32>
    %320 = arith.divf %318, %319 : vector<2x96xf32>
    %321 = vector.extract_strided_slice %314 {offsets = [0, 96], sizes = [2, 32], strides = [1, 1]} : vector<2x128xf32> to vector<2x32xf32>
    %322 = math.tanh %321 : vector<2x32xf32>
    %323 = vector.extract_strided_slice %320 {offsets = [0, 32], sizes = [2, 32], strides = [1, 1]} : vector<2x96xf32> to vector<2x32xf32>
    %324 = arith.mulf %323, %308 : vector<2x32xf32>
    %325 = vector.extract_strided_slice %320 {offsets = [0, 0], sizes = [2, 32], strides = [1, 1]} : vector<2x96xf32> to vector<2x32xf32>
    %326 = arith.mulf %325, %322 : vector<2x32xf32>
    %327 = arith.addf %324, %326 : vector<2x32xf32>
    %328 = vector.extract_strided_slice %320 {offsets = [0, 64], sizes = [2, 32], strides = [1, 1]} : vector<2x96xf32> to vector<2x32xf32>
    %329 = math.tanh %327 : vector<2x32xf32>
    %330 = arith.mulf %328, %329 : vector<2x32xf32>
    %331 = vector.extract_strided_slice %193 {offsets = [14, 0], sizes = [2, 128], strides = [1, 1]} : vector<16x128xf32> to vector<2x128xf32>
    %cst_73 = arith.constant dense<0.000000e+00> : vector<2x128xf32>
    %332 = tpu.matmul %330, %187, %cst_73 {dimension_numbers = #tpu.dot_dimension_numbers<[1], [0], [0], [1], [0, 0, 1, 1], [], []>} : vector<2x32xf32>, vector<32x128xf32>, vector<2x128xf32> -> vector<2x128xf32>
    %333 = arith.addf %331, %332 : vector<2x128xf32>
    %334 = vector.extract_strided_slice %333 {offsets = [0, 0], sizes = [2, 96], strides = [1, 1]} : vector<2x128xf32> to vector<2x96xf32>
    %335 = arith.negf %334 : vector<2x96xf32>
    %336 = math.exp %335 : vector<2x96xf32>
    %cst_74 = arith.constant 1.000000e+00 : f32
    %337 = vector.broadcast %cst_74 : f32 to vector<2x96xf32>
    %338 = arith.addf %337, %336 : vector<2x96xf32>
    %339 = arith.divf %337, %338 : vector<2x96xf32>
    %340 = vector.extract_strided_slice %333 {offsets = [0, 96], sizes = [2, 32], strides = [1, 1]} : vector<2x128xf32> to vector<2x32xf32>
    %341 = math.tanh %340 : vector<2x32xf32>
    %342 = vector.extract_strided_slice %339 {offsets = [0, 32], sizes = [2, 32], strides = [1, 1]} : vector<2x96xf32> to vector<2x32xf32>
    %343 = arith.mulf %342, %327 : vector<2x32xf32>
    %344 = vector.extract_strided_slice %339 {offsets = [0, 0], sizes = [2, 32], strides = [1, 1]} : vector<2x96xf32> to vector<2x32xf32>
    %345 = arith.mulf %344, %341 : vector<2x32xf32>
    %346 = arith.addf %343, %345 : vector<2x32xf32>
    %347 = vector.extract_strided_slice %339 {offsets = [0, 64], sizes = [2, 32], strides = [1, 1]} : vector<2x96xf32> to vector<2x32xf32>
    %348 = math.tanh %346 : vector<2x32xf32>
    %349 = arith.mulf %347, %348 : vector<2x32xf32>
    %c1_75 = arith.constant 1 : index
    %c0_76 = arith.constant 0 : index
    %c0_77 = arith.constant 0 : index
    %350 = vector.load %arg12[%c1_75, %c0_76, %c0_77] : memref<2x2x32xf32, #tpu.memory_space<vmem>>, vector<1x2x32xf32>
    %351 = vector.shape_cast %350 : vector<1x2x32xf32> to vector<2x32xf32>
    %352 = vector.shape_cast %349 : vector<2x32xf32> to vector<1x2x32xf32>
    tpu.vector_store %arg12[%c1_75, %c0_76, %c0_77], %352 {strides = array<i32>} : memref<2x2x32xf32, #tpu.memory_space<vmem>>, vector<1x2x32xf32>,
    %c1_78 = arith.constant 1 : index
    %c0_79 = arith.constant 0 : index
    %c0_80 = arith.constant 0 : index
    %353 = vector.load %arg13[%c1_78, %c0_79, %c0_80] : memref<2x2x32xf32, #tpu.memory_space<vmem>>, vector<1x2x32xf32>
    %354 = vector.shape_cast %353 : vector<1x2x32xf32> to vector<2x32xf32>
    %355 = vector.shape_cast %346 : vector<2x32xf32> to vector<1x2x32xf32>
    tpu.vector_store %arg13[%c1_78, %c0_79, %c0_80], %355 {strides = array<i32>} : memref<2x2x32xf32, #tpu.memory_space<vmem>>, vector<1x2x32xf32>,
    %cst_81 = arith.constant 0.000000e+00 : f32
    %356 = vector.broadcast %cst_81 : f32 to vector<2x32xf32>
    %357 = arith.maximumf %349, %356 : vector<2x32xf32>
    %c0_82 = arith.constant 0 : index
    %c0_83 = arith.constant 0 : index
    %358 = vector.load %arg9[%c0_82, %c0_83] : memref<32x4xf32, #tpu.memory_space<vmem>>, vector<32x4xf32>
    %cst_84 = arith.constant dense<0.000000e+00> : vector<2x4xf32>
    %359 = tpu.matmul %357, %358, %cst_84 {dimension_numbers = #tpu.dot_dimension_numbers<[1], [0], [0], [1], [0, 0, 1, 1], [], []>} : vector<2x32xf32>, vector<32x4xf32>, vector<2x4xf32> -> vector<2x4xf32>
    %c0_85 = arith.constant 0 : index
    %c0_86 = arith.constant 0 : index
    %360 = vector.load %arg10[%c0_85, %c0_86] : memref<1x4xf32, #tpu.memory_space<vmem>>, vector<1x4xf32>
    %361 = vector.broadcast %360 : vector<1x4xf32> to vector<2x4xf32>
    %362 = arith.addf %359, %361 : vector<2x4xf32>
    %c0_87 = arith.constant 0 : index
    %c0_88 = arith.constant 0 : index
    %363 = vector.load %arg11[%c0_87, %c0_88] : memref<2x4xf32, #tpu.memory_space<vmem>>, vector<2x4xf32>
    tpu.vector_store %arg11[%c0_87, %c0_88], %362 {strides = array<i32>} : memref<2x4xf32, #tpu.memory_space<vmem>>, vector<2x4xf32>,
    return
  }
}

</mosaic_0001>

<bundles_post_ra>
// kernel: tpu_custom_call.1
= control target key start
LH: loop header
LB: loop body
LE: loop exit
PB: predicated region body
PF: predicated region fallthrough
CT: control target
= control target key end

     0   :  { %19 = vsyncpa [#allocation4], 0  ;;  %s3898_s0 = inlined_call_operand.vmem [shape: f32[2,8,16], index: 0, kind: input, shape index: {}]   ;;  %s3899_s1 = inlined_call_operand.hbm [shape: f32[2,2,32], index: 1, kind: input, shape index: {}]   ;;  %s3900_s2 = inlined_call_operand.hbm [shape: f32[2,2,32], index: 2, kind: input, shape index: {}]   ;;  %s3901_s3 = inlined_call_operand.hbm [shape: f32[16,128], index: 3, kind: input, shape index: {}]   ;;  %s3902_s4 = inlined_call_operand.vmem [shape: f32[32,128], index: 4, kind: input, shape index: {}]   ;;  %s3903_s5 = inlined_call_operand.vmem [shape: f32[1,128], index: 5, kind: input, shape index: {}]   ;;  %s3904_s6 = inlined_call_operand.hbm [shape: f32[32,128], index: 6, kind: input, shape index: {}]   ;;  %s3905_s7 = inlined_call_operand.hbm [shape: f32[32,128], index: 7, kind: input, shape index: {}]   ;;  %s3906_s8 = inlined_call_operand.vmem [shape: f32[1,128], index: 8, kind: input, shape index: {}]   ;;  %s3907_s9 = inlined_call_operand.vmem [shape: f32[32,4], index: 9, kind: input, shape index: {}]   ;;  %s3908_s10 = inlined_call_operand.vmem [shape: f32[1,4], index: 10, kind: input, shape index: {}]   ;;  %s3909_s11 = inlined_call_operand.hbm [shape: f32[2,4], index: 11, kind: output, shape index: {0}]   ;;  %s3910_s12 = inlined_call_operand.hbm [shape: f32[2,2,32], index: 12, kind: output, shape index: {1}]   ;;  %s3911_s13 = inlined_call_operand.hbm [shape: f32[2,2,32], index: 13, kind: output, shape index: {2}]  }
   0x1   :  { %20 = vsyncpa [#allocation7], 0 }
   0x2   :  { %21 = vsyncpa [#allocation10], 0 }
   0x3   :  { %22 = vsyncpa [#allocation5], 0 }
   0x4   :  { %23 = vsyncpa [#allocation14], 0  ;;  %s3356_s25 = smov [#allocation6]   ;;  %s3170_s29 = scalar_lea.hbm %s3900_s2, 64 }
   0x5   :  { %s43_s26 = sshll.u32 %s3356_s25, 4  ;;  %p3171_p0 = scmp.ne.s32.totalorder %s3900_s2, %s3170_s29  ;;  %s44_s26 = int_to_ptr.vmem [resolvable:$true] %s43_s26 }
   0x6   :  { %p3174_p1 = scmp.lt.u32.totalorder %s3170_s29, %s3900_s2 }
   0x8   :  { %p3176_p2 = pnand %p3174_p1, %p3171_p0 }
   0xa   :  { %3179 = shalt.err (!%p3176_p2)
}
   0xb   :  { %s3180_s17 = scalar_lea.vmem %s44_s26, 64  ;;  %p3185_p4 = scmp.lt.s32.totalorder %s44_s26, %s44_s26 }
   0xc   :  { %p3181_p3 = scmp.ne.s32.totalorder %s44_s26, %s3180_s17  ;;  %p3186_p5 = scmp.lt.s32.totalorder %s3180_s17, %s3180_s17 }
   0xe   :  { %p3187_p6 = por %p3186_p5, %p3185_p4 }
  0x10   :  { %p3188_p7 = pnand %p3187_p6, %p3181_p3 }
  0x12   :  { %3191 = shalt.err (!%p3188_p7)
}
  0x13   :  { %s3357_s18 = smov 32   ;;  %s3358_s19 = smov 2  }
  0x14   :  { %49 = dma.hbm_to_vmem [thread:$0]  %s3900_s2, 64, %s44_s26, [#allocation7], %s3357_s18, %s3357_s18, %s3358_s19  }
  0x15   :  { %s3359_s22 = smov [#allocation9]   ;;  %s3360_s24 = smov [#allocation3]  }
  0x16   :  { %s71_s23 = sshll.u32 %s3359_s22, 4  ;;  %s31_s25 = sshll.u32 %s3360_s24, 4  ;;  %s72_s23 = int_to_ptr.vmem [resolvable:$true] %s71_s23  ;;  %s32_s25 = int_to_ptr.vmem [resolvable:$true] %s31_s25 }
  0x17   :  { %s3192_s29 = scalar_lea.hbm %s3904_s6, 512 }
  0x18   :  { %p3193_p8 = scmp.ne.s32.totalorder %s3904_s6, %s3192_s29  ;;  %p3196_p9 = scmp.lt.u32.totalorder %s3192_s29, %s3904_s6 }
  0x1a   :  { %p3198_p10 = pnand %p3196_p9, %p3193_p8 }
  0x1c   :  { %3201 = shalt.err (!%p3198_p10)
}
  0x1d   :  { %s3202_s2 = scalar_lea.vmem %s72_s23, 512  ;;  %p3207_p12 = scmp.lt.s32.totalorder %s72_s23, %s72_s23 }
  0x1e   :  { %p3203_p11 = scmp.ne.s32.totalorder %s72_s23, %s3202_s2  ;;  %p3208_p13 = scmp.lt.s32.totalorder %s3202_s2, %s3202_s2 }
  0x20   :  { %p3209_p0 = por %p3208_p13, %p3207_p12 }
  0x22   :  { %p3210_p1 = pnand %p3209_p0, %p3203_p11 }
  0x24   :  { %3213 = shalt.err (!%p3210_p1)
}
  0x25   :  { %s3361_s26 = smov 128   ;;  %s3362_s17 = smov 8  }
  0x26   :  { %77 = dma.hbm_to_vmem [thread:$0]  %s3904_s6, 512, %s72_s23, [#allocation10], %s3361_s26, %s3361_s26, %s3362_s17  }
  0x27   :  { %s3214_s27 = scalar_lea.hbm %s3899_s1, 64 }
  0x28   :  { %p3215_p2 = scmp.ne.s32.totalorder %s3899_s1, %s3214_s27  ;;  %p3218_p3 = scmp.lt.u32.totalorder %s3214_s27, %s3899_s1 }
  0x2a   :  { %p3220_p4 = pnand %p3218_p3, %p3215_p2 }
  0x2c   :  { %3223 = shalt.err (!%p3220_p4)
}
  0x2d   :  { %s3224_s15 = scalar_lea.vmem %s32_s25, 64  ;;  %p3229_p6 = scmp.lt.s32.totalorder %s32_s25, %s32_s25 }
  0x2e   :  { %p3225_p5 = scmp.ne.s32.totalorder %s32_s25, %s3224_s15  ;;  %p3230_p7 = scmp.lt.s32.totalorder %s3224_s15, %s3224_s15 }
  0x30   :  { %p3231_p8 = por %p3230_p7, %p3229_p6 }
  0x32   :  { %p3232_p9 = pnand %p3231_p8, %p3225_p5 }
  0x34   :  { %3235 = shalt.err (!%p3232_p9)
}
  0x35   :  { %37 = dma.hbm_to_vmem [thread:$0]  %s3899_s1, 64, %s32_s25, [#allocation4], %s3357_s18, %s3357_s18, %s3358_s19  }
  0x36   :  { %s3363_s16 = smov [#allocation8]   ;;  %s3364_s20 = smov [#allocation11]  }
  0x37   :  { %s55_s2 = sshll.u32 %s3363_s16, 4  ;;  %s83_s21 = sshll.u32 %s3364_s20, 4  ;;  %s56_s2 = int_to_ptr.vmem [resolvable:$true] %s55_s2  ;;  %s84_s21 = int_to_ptr.vmem [resolvable:$true] %s83_s21 }
  0x38   :  { %s3236_s27 = scalar_lea.hbm %s3901_s3, 256 }
  0x39   :  { %p3237_p10 = scmp.ne.s32.totalorder %s3901_s3, %s3236_s27  ;;  %p3240_p11 = scmp.lt.u32.totalorder %s3236_s27, %s3901_s3 }
  0x3b   :  { %p3242_p12 = pnand %p3240_p11, %p3237_p10 }
  0x3d   :  { %3245 = shalt.err (!%p3242_p12)
}
  0x3e   :  { %s3246_s1 = scalar_lea.vmem %s56_s2, 256  ;;  %p3251_p0 = scmp.lt.s32.totalorder %s56_s2, %s56_s2 }
  0x3f   :  { %p3247_p13 = scmp.ne.s32.totalorder %s56_s2, %s3246_s1  ;;  %p3252_p1 = scmp.lt.s32.totalorder %s3246_s1, %s3246_s1 }
  0x41   :  { %p3253_p2 = por %p3252_p1, %p3251_p0 }
  0x43   :  { %p3254_p3 = pnand %p3253_p2, %p3247_p13 }
  0x45   :  { %3257 = shalt.err (!%p3254_p3)
}
  0x46   :  { %61 = dma.hbm_to_vmem [thread:$0]  %s3901_s3, 256, %s56_s2, [#allocation7], %s3361_s26, %s3361_s26, %s3362_s17  }
  0x47   :  { %s3258_s16 = scalar_lea.hbm %s3905_s7, 512 }
  0x48   :  { %p3259_p4 = scmp.ne.s32.totalorder %s3905_s7, %s3258_s16  ;;  %p3262_p5 = scmp.lt.u32.totalorder %s3258_s16, %s3905_s7 }
  0x4a   :  { %p3264_p6 = pnand %p3262_p5, %p3259_p4 }
  0x4c   :  { %3267 = shalt.err (!%p3264_p6)
}
  0x4d   :  { %s3268_s28 = scalar_lea.vmem %s84_s21, 512  ;;  %p3273_p8 = scmp.lt.s32.totalorder %s84_s21, %s84_s21 }
  0x4e   :  { %p3269_p7 = scmp.ne.s32.totalorder %s84_s21, %s3268_s28  ;;  %p3274_p9 = scmp.lt.s32.totalorder %s3268_s28, %s3268_s28 }
  0x50   :  { %p3275_p10 = por %p3274_p9, %p3273_p8 }
  0x52   :  { %p3276_p11 = pnand %p3275_p10, %p3269_p7 }
  0x54   :  { %3279 = shalt.err (!%p3276_p11)
}
  0x55   :  { %89 = dma.hbm_to_vmem [thread:$0]  %s3905_s7, 512, %s84_s21, [#allocation10], %s3361_s26, %s3361_s26, %s3362_s17  }
  0x56   :  { %3346 = dma.done.wait [#allocation4], 64  }
  0x57   :  { %3347 = vsyncadd [#allocation4], 4294967232 }
  0x58   :  { %3348 = dma.done.wait [#allocation7], 320  }
  0x59   :  { %3349 = vsyncadd [#allocation7], 4294966976 }
  0x5a   :  { %3350 = dma.done.wait [#allocation10], 1024  }
  0x5b   :  { %3351 = vsyncadd [#allocation10], 4294966272  ;;  %v3365_v0 = vmov 0.0|0.0   ;;  %vm3366_vm0 = vmmov 0   ;;  %v3367_v1 = vmov 0.0   ;;  %vm126_vm1 = vcmask 130048  }
  0x5c   :  { %2851 = vmatprep.subr.bf16.mxu1 %v3365_v0  ;;  %2657 = vmatprep.mubr.msk.f32.mxu1 %vm3366_vm0, %v3367_v1  ;;  %v117_v2 = vld [vmem:[#allocation8] sm:$0xff]  ;;  %v118_v3 = vld [vmem:[#allocation8 + $0x8] sm:$0xff]  ;;  %v112_v6 = vld [vmem:[%s3902_s4 + $0x8] sm:$0xff]  ;;  %vm210_vm2 = vcmask 261120   ;;  %vm349_vm3 = vcmask 1041409   ;;  %vm354_vm4 = vcmask 254976  }
  0x5d   :  { %v111_v4 = vld [vmem:[%s3902_s4] sm:$0xff]  ;;  %v2847_v5 = vpack.c.bf16 %v118_v3, %v117_v2  ;;  %v113_v9 = vld [vmem:[%s3902_s4 + $0x10] sm:$0xff]  ;;  %v114_v10 = vld [vmem:[%s3902_s4 + $0x18] sm:$0xff]  ;;  %vm491_vm5 = vcmask 1042434   ;;  %vm638_vm6 = vcmask 1043459   ;;  %vm786_vm7 = vcmask 1044484  }
  0x5e   :  { %v115_v7 = vld [vmem:[%s3898_s0] sm:$0xff]  ;;  %v3530_v8 = vpack.c.bf16 %v112_v6, %v111_v4  ;;  %v209_v11 = vld [vmem:[#allocation6] sm:$0x3]  ;;  %v116_v12 = vld [vmem:[%s3898_s0 + $0x8] sm:$0xff]  ;;  %v3543_v13 = vpack.c.bf16 %v114_v10, %v113_v9  ;;  %vm934_vm8 = vcmask 1045509   ;;  %vm1082_vm9 = vcmask 1046534  }
  0x5f   :  { %2646 = vmatprep.mubr.msk.f32.mxu0 %vm126_vm1, %v115_v7  ;;  %2848 = vmatprep.subr.bf16.mxu0 %v2847_v5  ;;  %v305_v14 = vrot.slane %v209_v11, 1  ;;  %v208_v15 = vld [vmem:[#allocation3] sm:$0x3]  ;;  %v2499_v18 = vld [vmem:[%s3903_s5] ss:$0 sm:$0xff]  ;;  %s3368_s5 = smov 64  }
  0x60   :  { %2853 = vmatpush3.bf16.msra.mxu1 %v3530_v8  ;;  %2850 = vmatpush3.bf16.msra.mxu0 %v2847_v5  ;;  %vm1230_vm10 = vcmask 1047559   ;;  %vm643_vm11 = vcmask 257026   ;;  %vm496_vm12 = vcmask 256001   ;;  %vm939_vm13 = vcmask 259076   ;;  %s3369_s30 = smov 96  }
  0x61   :  { %2854 = vmatprep.subr.bf16.mxu1 %v3365_v0  ;;  %2857 = vmatprep.subr.bf16.mxu0 %v3365_v0  ;;  %vm791_vm14 = vcmask 258051   ;;  %vm1235_vm15 = vcmask 261126  }
  0x62   :  { %308 = vrot.lane.b32.xlu1 %v305_v14, %s3357_s18 }
  0x63   :  { %2647 = vmatmul.mubr.msk.f32.vlgmr.msra.gmra.mrb[0].mxu0 %vm126_vm1, %v116_v12  ;;  %vm1087_vm1 = vcmask 260101  }
  0x64   :  { %2856 = vmatpush3.bf16.msra.mxu1 %v3543_v13  ;;  %2859 = vmatpush3.bf16.msra.mxu0 %v3530_v8 }
  0x65   :  { %2860 = vmatprep.subr.bf16.mxu0 %v3365_v0  ;;  %2668 = vmatprep.mubr.msk.f32.mxu0 %vm3366_vm0, %v3367_v1 }
  0x66   :  { %306 = vrot.lane.b32.xlu1 %v209_v11, %s3357_s18  ;;  %2863 = vmatprep.subr.bf16.mxu1 %v3365_v0 }
  0x67   :  { %2658 = vmatmul.mubr.msk.f32.vlgmr.msra.gmra.mrb[0].mxu1 %vm210_vm2, %v208_v15 }
  0x68   :  { %2862 = vmatpush3.bf16.msra.mxu0 %v3543_v13  ;;  %2865 = vmatpush3.bf16.msra.mxu1 %v3530_v8 }
  0x69   :  { %2866 = vmatprep.subr.bf16.mxu1 %v3365_v0  ;;  %2679 = vmatprep.mubr.msk.f32.mxu1 %vm3366_vm0, %v3367_v1 }
  0x6a   :  { %2869 = vmatprep.subr.bf16.mxu0 %v3365_v0 }
  0x6c   :  { %2868 = vmatpush3.bf16.msra.mxu1 %v3543_v13 }
  0x6d   :  { %2875 = vmatprep.subr.bf16.mxu1 %v3365_v0 }
  0xd4   :  { %v309_v40 = vpop.permute.xlu1 %308 }
  0xd8   :  { %v307_v42 = vpop.permute.xlu1 %306 }
 0x136   :  { %v2648_v16 = vpop.f32.mrb[0].mxu0 }
 0x137   :  { %v199_v17 = vpop.f32.mrb[1].mxu0  ;;  %v3568_v19 = vadd.f32 %v2648_v16, %v2499_v18 }
 0x138   :  { %v3570_v23 = vadd.f32 %v2499_v18, %v199_v17 }
 0x13a   :  { %v280_v20 = vpop.f32.mrb[0].mxu1 }
 0x13b   :  { %v285_v21 = vrot.slane %v280_v20, 1  ;;  %v2659_v22 = vpop.f32.mrb[1].mxu1  ;;  %v288_v25 = vadd.f32 %v280_v20, %v3570_v23 }
 0x13d   :  { %v289_v24 = vadd.f32 %v285_v21, %v3568_v19  ;;  %v2503_v29 = vmul.f32 -1.442695, %v288_v25 }
 0x13f   :  { %2978 = vtanh.f32 %v289_v24  ;;  %v2504_v28 = vmul.f32 -1.442695, %v289_v24 }
 0x140   :  { %2980 = vtanh.f32 %v288_v25 }
 0x141   :  { %2982 = vpow2.f32 %v2504_v28 }
 0x142   :  { %2984 = vpow2.f32 %v2503_v29 }
 0x149   :  { %v2979_v26 = vpop.eup %2978 }
 0x14a   :  { %318 = vrot.lane.b32.xlu0 %v2979_v26, %s3357_s18  ;;  %v2981_v27 = vpop.eup %2980 }
 0x14b   :  { %v2983_v30 = vpop.eup %2982 }
 0x14c   :  { %v297_v31 = vadd.f32 1.0, %v2983_v30  ;;  %v2985_v32 = vpop.eup %2984 }
 0x14d   :  { %v296_v33 = vadd.f32 1.0, %v2985_v32 }
 0x14e   :  { %316 = vrot.lane.b32.xlu0 %v2981_v27, %s3357_s18  ;;  %2986 = vrcp.f32 %v297_v31 }
 0x14f   :  { %2988 = vrcp.f32 %v296_v33 }
 0x158   :  { %v2987_v34 = vpop.eup %2986 }
 0x159   :  { %v2989_v37 = vpop.eup %2988  ;;  %v313_v41 = vmul.f32 %v2987_v34, %v309_v40 }
 0x15a   :  { %v312_v45 = vmul.f32 %v2989_v37, %v307_v42 }
 0x1bc   :  { %v319_v35 = vpop.permute.xlu0 %318 }
 0x1bd   :  { %v323_v36 = vmul.f32 %v2987_v34, %v319_v35 }
 0x1bf   :  { %328 = vrot.lane.b32.xlu0 %v323_v36, %s3357_s18 }
 0x1c0   :  { %v317_v38 = vpop.permute.xlu0 %316 }
 0x1c1   :  { %v322_v39 = vmul.f32 %v2989_v37, %v317_v38 }
 0x1c3   :  { %326 = vrot.lane.b32.xlu1 %v322_v39, %s3357_s18 }
 0x231   :  { %v329_v43 = vpop.permute.xlu0 %328 }
 0x232   :  { %v333_v44 = vadd.f32 %v329_v43, %v313_v41 }
 0x234   :  { %2990 = vtanh.f32 %v333_v44  ;;  %v451_v16 = vrot.slane %v333_v44, 7 }
 0x235   :  { %v327_v46 = vpop.permute.xlu1 %326 }
 0x236   :  { %v332_v47 = vadd.f32 %v327_v46, %v312_v45 }
 0x238   :  { %2992 = vtanh.f32 %v332_v47  ;;  %v450_v18 = vrot.slane %v332_v47, 7 }
 0x23e   :  { %v2991_v48 = vpop.eup %2990 }
 0x23f   :  { %340 = vrot.lane.b32.xlu0 %v2991_v48, %s3357_s18 }
 0x242   :  { %v2993_v49 = vpop.eup %2992 }
 0x243   :  { %338 = vrot.lane.b32.xlu1 %v2993_v49, %s3357_s18 }
 0x2b1   :  { %v341_v50 = vpop.permute.xlu0 %340 }
 0x2b2   :  { %v345_v51 = vmul.f32 %v2987_v34, %v341_v50 }
 0x2b4   :  { %v348_v53 = vrot.slane %v345_v51, 7 }
 0x2b5   :  { %v339_v52 = vpop.permute.xlu1 %338 }
 0x2b6   :  { %v344_v54 = vmul.f32 %v2989_v37, %v339_v52 }
 0x2b8   :  { %v350_v55 = vsel %vm349_vm3, %v348_v53, %v344_v54 }
 0x2b9   :  { %351 = vrot.lane.b32.xlu0 %v350_v55, %s3368_s5 }
 0x32b   :  { %v352_v56 = vpop.permute.xlu0 %351 }
 0x32c   :  { %355 = vst.msk [vmem:[#allocation2] sm:$0x3] %vm354_vm4, %v352_v56  ;;  %2669 = vmatmul.mubr.msk.f32.vlgmr.msra.gmra.mrb[2].mxu0 %vm210_vm2, %v352_v56  ;;  %vm1386_vm4 = vcmask 253952  }
 0x32d   :  { %2871 = vmatpush3.bf16.msra.mxu0 %v3530_v8  ;;  %2690 = vmatprep.mubr.msk.f32.mxu0 %vm3366_vm0, %v3367_v1 }
 0x32e   :  { %2872 = vmatprep.subr.bf16.mxu0 %v3365_v0 }
 0x331   :  { %2874 = vmatpush3.bf16.msra.mxu0 %v3543_v13 }
 0x332   :  { %2881 = vmatprep.subr.bf16.mxu0 %v3365_v0 }
 0x3ff   :  { %v424_v57 = vpop.f32.mrb[2].mxu0 }
 0x400   :  { %v429_v58 = vrot.slane %v424_v57, 7  ;;  %v433_v59 = vadd.f32 %v424_v57, %v3568_v19  ;;  %v2670_v60 = vpop.f32.mrb[3].mxu0 }
 0x402   :  { %v432_v61 = vadd.f32 %v429_v58, %v3570_v23  ;;  %2994 = vtanh.f32 %v433_v59  ;;  %v2507_v2 = vmul.f32 -1.442695, %v433_v59 }
 0x404   :  { %2996 = vtanh.f32 %v432_v61  ;;  %v2506_v3 = vmul.f32 -1.442695, %v432_v61 }
 0x405   :  { %2998 = vpow2.f32 %v2507_v2 }
 0x406   :  { %3000 = vpow2.f32 %v2506_v3 }
 0x40c   :  { %v2995_v62 = vpop.eup %2994 }
 0x40d   :  { %460 = vrot.lane.b32.xlu0 %v2995_v62, %s3357_s18 }
 0x40e   :  { %v2997_v63 = vpop.eup %2996 }
 0x40f   :  { %458 = vrot.lane.b32.xlu1 %v2997_v63, %s3357_s18  ;;  %v2999_v4 = vpop.eup %2998 }
 0x410   :  { %v3001_v5 = vpop.eup %3000  ;;  %v441_v6 = vadd.f32 1.0, %v2999_v4 }
 0x411   :  { %v440_v7 = vadd.f32 1.0, %v3001_v5 }
 0x412   :  { %3002 = vrcp.f32 %v441_v6 }
 0x413   :  { %3004 = vrcp.f32 %v440_v7 }
 0x41c   :  { %v3003_v9 = vpop.eup %3002 }
 0x41d   :  { %v3005_v12 = vpop.eup %3004  ;;  %v455_v17 = vmul.f32 %v3003_v9, %v451_v16 }
 0x41e   :  { %v454_v22 = vmul.f32 %v3005_v12, %v450_v18 }
 0x47f   :  { %v461_v10 = vpop.permute.xlu0 %460 }
 0x480   :  { %v465_v11 = vmul.f32 %v3003_v9, %v461_v10 }
 0x481   :  { %v459_v14 = vpop.permute.xlu1 %458 }
 0x482   :  { %470 = vrot.lane.b32.xlu0 %v465_v11, %s3357_s18  ;;  %v464_v15 = vmul.f32 %v3005_v12, %v459_v14 }
 0x484   :  { %468 = vrot.lane.b32.xlu1 %v464_v15, %s3357_s18 }
 0x4f4   :  { %v471_v20 = vpop.permute.xlu0 %470 }
 0x4f5   :  { %v475_v21 = vadd.f32 %v471_v20, %v455_v17 }
 0x4f6   :  { %v469_v24 = vpop.permute.xlu1 %468 }
 0x4f7   :  { %3006 = vtanh.f32 %v475_v21  ;;  %v474_v25 = vadd.f32 %v469_v24, %v454_v22  ;;  %v598_v58 = vrot.slane %v475_v21, 7 }
 0x4f9   :  { %3008 = vtanh.f32 %v474_v25  ;;  %v597_v57 = vrot.slane %v474_v25, 7 }
 0x501   :  { %v3007_v26 = vpop.eup %3006 }
 0x502   :  { %482 = vrot.lane.b32.xlu0 %v3007_v26, %s3357_s18 }
 0x503   :  { %v3009_v27 = vpop.eup %3008 }
 0x504   :  { %480 = vrot.lane.b32.xlu1 %v3009_v27, %s3357_s18 }
 0x574   :  { %v483_v28 = vpop.permute.xlu0 %482 }
 0x575   :  { %v487_v29 = vmul.f32 %v3003_v9, %v483_v28 }
 0x576   :  { %v481_v31 = vpop.permute.xlu1 %480 }
 0x577   :  { %v490_v30 = vrot.slane %v487_v29, 7  ;;  %v486_v32 = vmul.f32 %v3005_v12, %v481_v31 }
 0x579   :  { %v498_v33 = vrot.slane %v486_v32, 1  ;;  %v3597_v34 = vsel %vm491_vm5, %v490_v30, %v486_v32 }
 0x57b   :  { %v499_v35 = vsel %vm349_vm3, %v487_v29, %v498_v33 }
 0x57c   :  { %500 = vrot.lane.b32.xlu1 %v499_v35, %s3368_s5 }
 0x5ee   :  { %v501_v36 = vpop.permute.xlu1 %500 }
 0x5ef   :  { %2680 = vmatmul.mubr.msk.f32.vlgmr.msra.gmra.mrb[2].mxu1 %vm210_vm2, %v501_v36 }
 0x5f0   :  { %2877 = vmatpush3.bf16.msra.mxu1 %v3530_v8  ;;  %2701 = vmatprep.mubr.msk.f32.mxu1 %vm3366_vm0, %v3367_v1 }
 0x5f1   :  { %2878 = vmatprep.subr.bf16.mxu1 %v3365_v0 }
 0x5f4   :  { %2880 = vmatpush3.bf16.msra.mxu1 %v3543_v13 }
 0x5f5   :  { %2887 = vmatprep.subr.bf16.mxu1 %v3365_v0 }
 0x6c2   :  { %v570_v37 = vpop.f32.mrb[2].mxu1 }
 0x6c3   :  { %v575_v38 = vrot.slane %v570_v37, 6  ;;  %v576_v39 = vrot.slane %v570_v37, 7  ;;  %v2681_v40 = vpop.f32.mrb[3].mxu1 }
 0x6c5   :  { %v579_v41 = vadd.f32 %v575_v38, %v3570_v23  ;;  %v580_v42 = vadd.f32 %v576_v39, %v3568_v19 }
 0x6c7   :  { %3010 = vtanh.f32 %v579_v41  ;;  %v2509_v45 = vmul.f32 -1.442695, %v579_v41  ;;  %v2510_v46 = vmul.f32 -1.442695, %v580_v42 }
 0x6c8   :  { %3012 = vtanh.f32 %v580_v42 }
 0x6c9   :  { %3014 = vpow2.f32 %v2509_v45 }
 0x6ca   :  { %3016 = vpow2.f32 %v2510_v46 }
 0x6d1   :  { %v3011_v43 = vpop.eup %3010 }
 0x6d2   :  { %v3013_v44 = vpop.eup %3012  ;;  %605 = vrot.lane.b32.xlu0 %v3011_v43, %s3357_s18 }
 0x6d3   :  { %607 = vrot.lane.b32.xlu1 %v3013_v44, %s3357_s18  ;;  %v3015_v47 = vpop.eup %3014 }
 0x6d4   :  { %v3017_v48 = vpop.eup %3016  ;;  %v587_v49 = vadd.f32 1.0, %v3015_v47 }
 0x6d5   :  { %v588_v50 = vadd.f32 1.0, %v3017_v48 }
 0x6d6   :  { %3018 = vrcp.f32 %v587_v49 }
 0x6d7   :  { %3020 = vrcp.f32 %v588_v50 }
 0x6e0   :  { %v3019_v51 = vpop.eup %3018 }
 0x6e1   :  { %v3021_v53 = vpop.eup %3020  ;;  %v601_v59 = vmul.f32 %v3019_v51, %v597_v57 }
 0x6e2   :  { %v602_v60 = vmul.f32 %v3021_v53, %v598_v58 }
 0x744   :  { %v606_v52 = vpop.permute.xlu0 %605 }
 0x745   :  { %v608_v54 = vpop.permute.xlu1 %607  ;;  %v611_v55 = vmul.f32 %v3019_v51, %v606_v52 }
 0x746   :  { %v612_v56 = vmul.f32 %v3021_v53, %v608_v54 }
 0x747   :  { %615 = vrot.lane.b32.xlu0 %v611_v55, %s3357_s18 }
 0x748   :  { %617 = vrot.lane.b32.xlu1 %v612_v56, %s3357_s18 }
 0x7b9   :  { %v616_v61 = vpop.permute.xlu0 %615 }
 0x7ba   :  { %v618_v62 = vpop.permute.xlu1 %617  ;;  %v621_v63 = vadd.f32 %v616_v61, %v601_v59 }
 0x7bb   :  { %v622_v2 = vadd.f32 %v618_v62, %v602_v60 }
 0x7bc   :  { %3022 = vtanh.f32 %v621_v63  ;;  %v745_v40 = vrot.slane %v621_v63, 7 }
 0x7bd   :  { %3024 = vtanh.f32 %v622_v2  ;;  %v746_v41 = vrot.slane %v622_v2, 7 }
 0x7c6   :  { %v3023_v3 = vpop.eup %3022 }
 0x7c7   :  { %v3025_v4 = vpop.eup %3024  ;;  %627 = vrot.lane.b32.xlu0 %v3023_v3, %s3357_s18 }
 0x7c8   :  { %629 = vrot.lane.b32.xlu1 %v3025_v4, %s3357_s18 }
 0x839   :  { %v628_v5 = vpop.permute.xlu0 %627 }
 0x83a   :  { %v630_v6 = vpop.permute.xlu1 %629  ;;  %v633_v7 = vmul.f32 %v3019_v51, %v628_v5 }
 0x83b   :  { %v634_v9 = vmul.f32 %v3021_v53, %v630_v6 }
 0x83c   :  { %v645_v10 = vrot.slane %v633_v7, 2 }
 0x83d   :  { %v637_v11 = vrot.slane %v634_v9, 7  ;;  %v646_v12 = vrot.slane %v634_v9, 1 }
 0x83f   :  { %v647_v14 = vsel %vm349_vm3, %v646_v12, %v645_v10  ;;  %v3617_v15 = vsel %vm638_vm6, %v637_v11, %v633_v7 }
 0x840   :  { %648 = vrot.lane.b32.xlu0 %v647_v14, %s3368_s5 }
 0x8b2   :  { %v649_v16 = vpop.permute.xlu0 %648 }
 0x8b3   :  { %2691 = vmatmul.mubr.msk.f32.vlgmr.msra.gmra.mrb[4].mxu0 %vm210_vm2, %v649_v16 }
 0x8b4   :  { %2883 = vmatpush3.bf16.msra.mxu0 %v3530_v8  ;;  %2712 = vmatprep.mubr.msk.f32.mxu0 %vm3366_vm0, %v3367_v1 }
 0x8b5   :  { %2884 = vmatprep.subr.bf16.mxu0 %v3365_v0 }
 0x8b8   :  { %2886 = vmatpush3.bf16.msra.mxu0 %v3543_v13 }
 0x8b9   :  { %2893 = vmatprep.subr.bf16.mxu0 %v3365_v0 }
 0x986   :  { %v718_v17 = vpop.f32.mrb[4].mxu0 }
 0x987   :  { %v723_v18 = vrot.slane %v718_v17, 5  ;;  %v724_v20 = vrot.slane %v718_v17, 6  ;;  %v2692_v21 = vpop.f32.mrb[5].mxu0 }
 0x989   :  { %v727_v22 = vadd.f32 %v723_v18, %v3570_v23  ;;  %v728_v24 = vadd.f32 %v724_v20, %v3568_v19 }
 0x98b   :  { %3026 = vtanh.f32 %v727_v22  ;;  %v2512_v27 = vmul.f32 -1.442695, %v727_v22  ;;  %v2513_v28 = vmul.f32 -1.442695, %v728_v24 }
 0x98c   :  { %3028 = vtanh.f32 %v728_v24 }
 0x98d   :  { %3030 = vpow2.f32 %v2512_v27 }
 0x98e   :  { %3032 = vpow2.f32 %v2513_v28 }
 0x995   :  { %v3027_v25 = vpop.eup %3026 }
 0x996   :  { %v3029_v26 = vpop.eup %3028  ;;  %753 = vrot.lane.b32.xlu1 %v3027_v25, %s3357_s18 }
 0x997   :  { %755 = vrot.lane.b32.xlu0 %v3029_v26, %s3357_s18  ;;  %v3031_v29 = vpop.eup %3030 }
 0x998   :  { %v3033_v30 = vpop.eup %3032  ;;  %v735_v31 = vadd.f32 1.0, %v3031_v29 }
 0x999   :  { %v736_v32 = vadd.f32 1.0, %v3033_v30 }
 0x99a   :  { %3034 = vrcp.f32 %v735_v31 }
 0x99b   :  { %3036 = vrcp.f32 %v736_v32 }
 0x9a4   :  { %v3035_v33 = vpop.eup %3034 }
 0x9a5   :  { %v3037_v36 = vpop.eup %3036  ;;  %v749_v42 = vmul.f32 %v3035_v33, %v745_v40 }
 0x9a6   :  { %v750_v43 = vmul.f32 %v3037_v36, %v746_v41 }
 0xa08   :  { %v754_v35 = vpop.permute.xlu1 %753 }
 0xa09   :  { %v756_v37 = vpop.permute.xlu0 %755  ;;  %v759_v38 = vmul.f32 %v3035_v33, %v754_v35 }
 0xa0a   :  { %v760_v39 = vmul.f32 %v3037_v36, %v756_v37 }
 0xa0b   :  { %763 = vrot.lane.b32.xlu1 %v759_v38, %s3357_s18 }
 0xa0c   :  { %765 = vrot.lane.b32.xlu0 %v760_v39, %s3357_s18 }
 0xa7d   :  { %v764_v44 = vpop.permute.xlu1 %763 }
 0xa7e   :  { %v766_v45 = vpop.permute.xlu0 %765  ;;  %v769_v46 = vadd.f32 %v764_v44, %v749_v42 }
 0xa7f   :  { %v770_v47 = vadd.f32 %v766_v45, %v750_v43 }
 0xa80   :  { %3038 = vtanh.f32 %v769_v46  ;;  %v893_v22 = vrot.slane %v769_v46, 7 }
 0xa81   :  { %3040 = vtanh.f32 %v770_v47  ;;  %v894_v24 = vrot.slane %v770_v47, 7 }
 0xa8a   :  { %v3039_v48 = vpop.eup %3038 }
 0xa8b   :  { %v3041_v49 = vpop.eup %3040  ;;  %775 = vrot.lane.b32.xlu1 %v3039_v48, %s3357_s18 }
 0xa8c   :  { %777 = vrot.lane.b32.xlu0 %v3041_v49, %s3357_s18 }
 0xafd   :  { %v776_v50 = vpop.permute.xlu1 %775 }
 0xafe   :  { %v778_v51 = vpop.permute.xlu0 %777  ;;  %v781_v52 = vmul.f32 %v3035_v33, %v776_v50 }
 0xaff   :  { %v782_v53 = vmul.f32 %v3037_v36, %v778_v51 }
 0xb00   :  { %v793_v54 = vrot.slane %v781_v52, 3 }
 0xb01   :  { %v785_v55 = vrot.slane %v782_v53, 7  ;;  %v794_v56 = vrot.slane %v782_v53, 2 }
 0xb03   :  { %v795_v57 = vsel %vm349_vm3, %v794_v56, %v793_v54  ;;  %v3636_v58 = vsel %vm786_vm7, %v785_v55, %v781_v52 }
 0xb04   :  { %796 = vrot.lane.b32.xlu1 %v795_v57, %s3368_s5 }
 0xb76   :  { %v797_v59 = vpop.permute.xlu1 %796 }
 0xb77   :  { %2702 = vmatmul.mubr.msk.f32.vlgmr.msra.gmra.mrb[4].mxu1 %vm210_vm2, %v797_v59 }
 0xb78   :  { %2889 = vmatpush3.bf16.msra.mxu1 %v3530_v8  ;;  %2723 = vmatprep.mubr.msk.f32.mxu1 %vm3366_vm0, %v3367_v1 }
 0xb79   :  { %2890 = vmatprep.subr.bf16.mxu1 %v3365_v0 }
 0xb7c   :  { %2892 = vmatpush3.bf16.msra.mxu1 %v3543_v13 }
 0xc4a   :  { %v866_v60 = vpop.f32.mrb[4].mxu1 }
 0xc4b   :  { %v871_v61 = vrot.slane %v866_v60, 4  ;;  %v872_v62 = vrot.slane %v866_v60, 5  ;;  %v2703_v63 = vpop.f32.mrb[5].mxu1 }
 0xc4d   :  { %v875_v2 = vadd.f32 %v871_v61, %v3570_v23  ;;  %v876_v3 = vadd.f32 %v872_v62, %v3568_v19 }
 0xc4f   :  { %3042 = vtanh.f32 %v875_v2  ;;  %v2515_v6 = vmul.f32 -1.442695, %v875_v2  ;;  %v2516_v7 = vmul.f32 -1.442695, %v876_v3 }
 0xc50   :  { %3044 = vtanh.f32 %v876_v3 }
 0xc51   :  { %3046 = vpow2.f32 %v2515_v6 }
 0xc52   :  { %3048 = vpow2.f32 %v2516_v7 }
 0xc59   :  { %v3043_v4 = vpop.eup %3042 }
 0xc5a   :  { %v3045_v5 = vpop.eup %3044  ;;  %901 = vrot.lane.b32.xlu0 %v3043_v4, %s3357_s18 }
 0xc5b   :  { %903 = vrot.lane.b32.xlu1 %v3045_v5, %s3357_s18  ;;  %v3047_v9 = vpop.eup %3046 }
 0xc5c   :  { %v3049_v10 = vpop.eup %3048  ;;  %v883_v11 = vadd.f32 1.0, %v3047_v9 }
 0xc5d   :  { %v884_v12 = vadd.f32 1.0, %v3049_v10 }
 0xc5e   :  { %3050 = vrcp.f32 %v883_v11 }
 0xc5f   :  { %3052 = vrcp.f32 %v884_v12 }
 0xc68   :  { %v3051_v14 = vpop.eup %3050 }
 0xc69   :  { %v3053_v17 = vpop.eup %3052  ;;  %v897_v25 = vmul.f32 %v3051_v14, %v893_v22 }
 0xc6a   :  { %v898_v26 = vmul.f32 %v3053_v17, %v894_v24 }
 0xccc   :  { %v902_v16 = vpop.permute.xlu0 %901 }
 0xccd   :  { %v904_v18 = vpop.permute.xlu1 %903  ;;  %v907_v20 = vmul.f32 %v3051_v14, %v902_v16 }
 0xcce   :  { %v908_v21 = vmul.f32 %v3053_v17, %v904_v18 }
 0xccf   :  { %911 = vrot.lane.b32.xlu0 %v907_v20, %s3357_s18 }
 0xcd0   :  { %913 = vrot.lane.b32.xlu1 %v908_v21, %s3357_s18 }
 0xd41   :  { %v912_v27 = vpop.permute.xlu0 %911 }
 0xd42   :  { %v914_v28 = vpop.permute.xlu1 %913  ;;  %v917_v29 = vadd.f32 %v912_v27, %v897_v25 }
 0xd43   :  { %v918_v30 = vadd.f32 %v914_v28, %v898_v26 }
 0xd44   :  { %3054 = vtanh.f32 %v917_v29  ;;  %v1041_v63 = vrot.slane %v917_v29, 7 }
 0xd45   :  { %3056 = vtanh.f32 %v918_v30  ;;  %v1042_v2 = vrot.slane %v918_v30, 7 }
 0xd4e   :  { %v3055_v31 = vpop.eup %3054 }
 0xd4f   :  { %v3057_v32 = vpop.eup %3056  ;;  %923 = vrot.lane.b32.xlu0 %v3055_v31, %s3357_s18 }
 0xd50   :  { %925 = vrot.lane.b32.xlu1 %v3057_v32, %s3357_s18 }
 0xdc1   :  { %v924_v33 = vpop.permute.xlu0 %923 }
 0xdc2   :  { %v926_v35 = vpop.permute.xlu1 %925  ;;  %v929_v36 = vmul.f32 %v3051_v14, %v924_v33 }
 0xdc3   :  { %v930_v37 = vmul.f32 %v3053_v17, %v926_v35 }
 0xdc4   :  { %v941_v38 = vrot.slane %v929_v36, 4 }
 0xdc5   :  { %v933_v39 = vrot.slane %v930_v37, 7  ;;  %v942_v40 = vrot.slane %v930_v37, 3 }
 0xdc7   :  { %v943_v41 = vsel %vm349_vm3, %v942_v40, %v941_v38  ;;  %v3654_v42 = vsel %vm934_vm8, %v933_v39, %v929_v36 }
 0xdc8   :  { %944 = vrot.lane.b32.xlu0 %v943_v41, %s3368_s5 }
 0xe3a   :  { %v945_v43 = vpop.permute.xlu0 %944 }
 0xe3b   :  { %2713 = vmatmul.mubr.msk.f32.vlgmr.msra.gmra.mrb[6].mxu0 %vm210_vm2, %v945_v43 }
 0xe3c   :  { %2895 = vmatpush3.bf16.msra.mxu0 %v3530_v8  ;;  %2734 = vmatprep.mubr.msk.f32.mxu0 %vm3366_vm0, %v3367_v1 }
 0xe3d   :  { %2896 = vmatprep.subr.bf16.mxu0 %v3365_v0 }
 0xe40   :  { %2898 = vmatpush3.bf16.msra.mxu0 %v3543_v13 }
 0xe41   :  { %2907 = vmatprep.subr.bf16.mxu0 %v3365_v0 }
 0xf0e   :  { %v1014_v44 = vpop.f32.mrb[6].mxu0 }
 0xf0f   :  { %v1019_v45 = vrot.slane %v1014_v44, 3  ;;  %v1020_v46 = vrot.slane %v1014_v44, 4  ;;  %v2714_v47 = vpop.f32.mrb[7].mxu0 }
 0xf11   :  { %v1023_v48 = vadd.f32 %v1019_v45, %v3570_v23  ;;  %v1024_v49 = vadd.f32 %v1020_v46, %v3568_v19 }
 0xf13   :  { %3058 = vtanh.f32 %v1023_v48  ;;  %v2518_v51 = vmul.f32 -1.442695, %v1023_v48  ;;  %v2519_v13 = vmul.f32 -1.442695, %v1024_v49 }
 0xf14   :  { %3060 = vtanh.f32 %v1024_v49 }
 0xf15   :  { %3062 = vpow2.f32 %v2518_v51 }
 0xf16   :  { %3064 = vpow2.f32 %v2519_v13 }
 0xf1d   :  { %v3059_v8 = vpop.eup %3058 }
 0xf1e   :  { %v3061_v50 = vpop.eup %3060  ;;  %1049 = vrot.lane.b32.xlu1 %v3059_v8, %s3357_s18 }
 0xf1f   :  { %1051 = vrot.lane.b32.xlu0 %v3061_v50, %s3357_s18  ;;  %v3063_v52 = vpop.eup %3062 }
 0xf20   :  { %v3065_v53 = vpop.eup %3064  ;;  %v1031_v54 = vadd.f32 1.0, %v3063_v52 }
 0xf21   :  { %v1032_v55 = vadd.f32 1.0, %v3065_v53 }
 0xf22   :  { %3066 = vrcp.f32 %v1031_v54 }
 0xf23   :  { %3068 = vrcp.f32 %v1032_v55 }
 0xf2c   :  { %v3067_v56 = vpop.eup %3066 }
 0xf2d   :  { %v3069_v59 = vpop.eup %3068  ;;  %v1045_v3 = vmul.f32 %v3067_v56, %v1041_v63 }
 0xf2e   :  { %v1046_v4 = vmul.f32 %v3069_v59, %v1042_v2 }
 0xf90   :  { %v1050_v57 = vpop.permute.xlu1 %1049 }
 0xf91   :  { %v1052_v60 = vpop.permute.xlu0 %1051  ;;  %v1055_v61 = vmul.f32 %v3067_v56, %v1050_v57 }
 0xf92   :  { %v1056_v62 = vmul.f32 %v3069_v59, %v1052_v60 }
 0xf93   :  { %1059 = vrot.lane.b32.xlu1 %v1055_v61, %s3357_s18 }
 0xf94   :  { %1061 = vrot.lane.b32.xlu0 %v1056_v62, %s3357_s18 }
0x1005   :  { %v1060_v5 = vpop.permute.xlu1 %1059 }
0x1006   :  { %v1062_v6 = vpop.permute.xlu0 %1061  ;;  %v1065_v7 = vadd.f32 %v1060_v5, %v1045_v3 }
0x1007   :  { %v1066_v9 = vadd.f32 %v1062_v6, %v1046_v4 }
0x1008   :  { %3070 = vtanh.f32 %v1065_v7  ;;  %v1189_v48 = vrot.slane %v1065_v7, 7 }
0x1009   :  { %3072 = vtanh.f32 %v1066_v9  ;;  %v1190_v49 = vrot.slane %v1066_v9, 7 }
0x1012   :  { %v3071_v10 = vpop.eup %3070 }
0x1013   :  { %v3073_v11 = vpop.eup %3072  ;;  %1071 = vrot.lane.b32.xlu1 %v3071_v10, %s3357_s18 }
0x1014   :  { %1073 = vrot.lane.b32.xlu0 %v3073_v11, %s3357_s18 }
0x1085   :  { %v1072_v12 = vpop.permute.xlu1 %1071 }
0x1086   :  { %v1074_v14 = vpop.permute.xlu0 %1073  ;;  %v1077_v16 = vmul.f32 %v3067_v56, %v1072_v12 }
0x1087   :  { %v1078_v17 = vmul.f32 %v3069_v59, %v1074_v14 }
0x1088   :  { %v1089_v18 = vrot.slane %v1077_v16, 5 }
0x1089   :  { %v1081_v20 = vrot.slane %v1078_v17, 7  ;;  %v1090_v21 = vrot.slane %v1078_v17, 4 }
0x108b   :  { %v1091_v22 = vsel %vm349_vm3, %v1090_v21, %v1089_v18  ;;  %v3673_v24 = vsel %vm1082_vm9, %v1081_v20, %v1077_v16 }
0x108c   :  { %1092 = vrot.lane.b32.xlu1 %v1091_v22, %s3368_s5 }
0x10fe   :  { %v1093_v25 = vpop.permute.xlu1 %1092 }
0x10ff   :  { %2724 = vmatmul.mubr.msk.f32.vlgmr.msra.gmra.mrb[6].mxu1 %vm210_vm2, %v1093_v25 }
0x11d2   :  { %v1162_v26 = vpop.f32.mrb[6].mxu1 }
0x11d3   :  { %v1167_v27 = vrot.slane %v1162_v26, 2  ;;  %v1168_v28 = vrot.slane %v1162_v26, 3  ;;  %v2725_v29 = vpop.f32.mrb[7].mxu1 }
0x11d5   :  { %v1171_v30 = vadd.f32 %v1167_v27, %v3570_v23  ;;  %v1172_v31 = vadd.f32 %v1168_v28, %v3568_v19 }
0x11d7   :  { %3074 = vtanh.f32 %v1171_v30  ;;  %v2521_v35 = vmul.f32 -1.442695, %v1171_v30  ;;  %v2522_v36 = vmul.f32 -1.442695, %v1172_v31 }
0x11d8   :  { %3076 = vtanh.f32 %v1172_v31 }
0x11d9   :  { %3078 = vpow2.f32 %v2521_v35 }
0x11da   :  { %3080 = vpow2.f32 %v2522_v36 }
0x11e1   :  { %v3075_v32 = vpop.eup %3074 }
0x11e2   :  { %v3077_v33 = vpop.eup %3076  ;;  %1197 = vrot.lane.b32.xlu0 %v3075_v32, %s3357_s18 }
0x11e3   :  { %1199 = vrot.lane.b32.xlu1 %v3077_v33, %s3357_s18  ;;  %v3079_v37 = vpop.eup %3078 }
0x11e4   :  { %v3081_v38 = vpop.eup %3080  ;;  %v1179_v39 = vadd.f32 1.0, %v3079_v37 }
0x11e5   :  { %v1180_v40 = vadd.f32 1.0, %v3081_v38 }
0x11e6   :  { %3082 = vrcp.f32 %v1179_v39 }
0x11e7   :  { %3084 = vrcp.f32 %v1180_v40  ;;  %v1407_v40 = vld [vmem:[#allocation9] sm:$0xff] }
0x11f0   :  { %v3083_v41 = vpop.eup %3082 }
0x11f1   :  { %v3085_v44 = vpop.eup %3084  ;;  %v1193_v8 = vmul.f32 %v3083_v41, %v1189_v48 }
0x11f2   :  { %v1194_v50 = vmul.f32 %v3085_v44, %v1190_v49 }
0x1254   :  { %v1198_v43 = vpop.permute.xlu0 %1197 }
0x1255   :  { %v1200_v45 = vpop.permute.xlu1 %1199  ;;  %v1203_v46 = vmul.f32 %v3083_v41, %v1198_v43 }
0x1256   :  { %v1204_v47 = vmul.f32 %v3085_v44, %v1200_v45  ;;  %v1409_v45 = vld [vmem:[#allocation9 + $0x10] sm:$0xff] }
0x1257   :  { %1207 = vrot.lane.b32.xlu0 %v1203_v46, %s3357_s18  ;;  %v1410_v46 = vld [vmem:[#allocation9 + $0x18] sm:$0xff] }
0x1258   :  { %1209 = vrot.lane.b32.xlu1 %v1204_v47, %s3357_s18  ;;  %v1404_v47 = vld [vmem:[#allocation11 + $0x18] sm:$0xff]  ;;  %v2903_v48 = vpack.c.bf16 %v1410_v46, %v1409_v45 }
0x12c9   :  { %v1208_v51 = vpop.permute.xlu0 %1207 }
0x12ca   :  { %v1210_v13 = vpop.permute.xlu1 %1209  ;;  %v1213_v52 = vadd.f32 %v1208_v51, %v1193_v8 }
0x12cb   :  { %v1214_v53 = vadd.f32 %v1210_v13, %v1194_v50  ;;  %v1500_v50 = vld [vmem:[#allocation3 + $0x2] sm:$0x3] }
0x12cc   :  { %3086 = vtanh.f32 %v1213_v52  ;;  %v1337_v29 = vrot.slane %v1213_v52, 7 }
0x12cd   :  { %3088 = vtanh.f32 %v1214_v53  ;;  %v1338_v30 = vrot.slane %v1214_v53, 7 }
0x12d6   :  { %v3087_v54 = vpop.eup %3086 }
0x12d7   :  { %v3089_v55 = vpop.eup %3088  ;;  %1219 = vrot.lane.b32.xlu0 %v3087_v54, %s3357_s18  ;;  %v1502_v54 = vld [vmem:[#allocation6 + $0x2] sm:$0x3] }
0x12d8   :  { %1221 = vrot.lane.b32.xlu1 %v3089_v55, %s3357_s18 }
0x1349   :  { %v1220_v56 = vpop.permute.xlu0 %1219 }
0x134a   :  { %v1222_v57 = vpop.permute.xlu1 %1221  ;;  %v1225_v59 = vmul.f32 %v3083_v41, %v1220_v56  ;;  %v1408_v41 = vld [vmem:[#allocation9 + $0x8] sm:$0xff] }
0x134b   :  { %v1226_v60 = vmul.f32 %v3085_v44, %v1222_v57  ;;  %v2899_v43 = vpack.c.bf16 %v1408_v41, %v1407_v40  ;;  %v1401_v44 = vld [vmem:[#allocation11] sm:$0xff] }
0x134c   :  { %v1237_v61 = vrot.slane %v1225_v59, 6 }
0x134d   :  { %v1229_v62 = vrot.slane %v1226_v60, 7  ;;  %v1238_v63 = vrot.slane %v1226_v60, 5  ;;  %2900 = vmatprep.subr.bf16.mxu1 %v2899_v43 }
0x134e   :  { %2902 = vmatpush3.bf16.msra.mxu1 %v2899_v43 }
0x134f   :  { %v1239_v2 = vsel %vm349_vm3, %v1238_v63, %v1237_v61  ;;  %v1231_v3 = vsel %vm1230_vm10, %v1229_v62, %v1225_v59  ;;  %2904 = vmatprep.subr.bf16.mxu1 %v2903_v48  ;;  %vm1384_vm3 = vcmask 261127  }
0x1350   :  { %1240 = vrot.lane.b32.xlu0 %v1239_v2, %s3368_s5 }
0x1352   :  { %2906 = vmatpush3.bf16.msra.mxu1 %v2903_v48 }
0x1353   :  { %2913 = vmatprep.subr.bf16.mxu1 %v3365_v0 }
0x13c2   :  { %v1241_v4 = vpop.permute.xlu0 %1240 }
0x13c3   :  { %2735 = vmatmul.mubr.msk.f32.vlgmr.msra.gmra.mrb[8].mxu0 %vm210_vm2, %v1241_v4  ;;  %v2526_v4 = vld [vmem:[%s3906_s8] ss:$0 sm:$0xff] }
0x13c4   :  { %2756 = vmatprep.mubr.msk.f32.mxu0 %vm3366_vm0, %v3367_v1 }
0x1496   :  { %v1310_v5 = vpop.f32.mrb[8].mxu0 }
0x1497   :  { %v1315_v6 = vrot.slane %v1310_v5, 1  ;;  %v1316_v7 = vrot.slane %v1310_v5, 2  ;;  %v2736_v9 = vpop.f32.mrb[9].mxu0 }
0x1499   :  { %v1319_v10 = vadd.f32 %v1315_v6, %v3570_v23  ;;  %v1320_v11 = vadd.f32 %v1316_v7, %v3568_v19 }
0x149b   :  { %3090 = vtanh.f32 %v1319_v10  ;;  %v2524_v16 = vmul.f32 -1.442695, %v1319_v10  ;;  %v2525_v17 = vmul.f32 -1.442695, %v1320_v11 }
0x149c   :  { %3092 = vtanh.f32 %v1320_v11 }
0x149d   :  { %3094 = vpow2.f32 %v2524_v16 }
0x149e   :  { %3096 = vpow2.f32 %v2525_v17 }
0x14a5   :  { %v3091_v12 = vpop.eup %3090 }
0x14a6   :  { %v3093_v14 = vpop.eup %3092  ;;  %1345 = vrot.lane.b32.xlu0 %v3091_v12, %s3357_s18 }
0x14a7   :  { %1347 = vrot.lane.b32.xlu1 %v3093_v14, %s3357_s18  ;;  %v3095_v18 = vpop.eup %3094 }
0x14a8   :  { %v3097_v20 = vpop.eup %3096  ;;  %v1327_v21 = vadd.f32 1.0, %v3095_v18 }
0x14a9   :  { %v1328_v22 = vadd.f32 1.0, %v3097_v20 }
0x14aa   :  { %3098 = vrcp.f32 %v1327_v21 }
0x14ab   :  { %3100 = vrcp.f32 %v1328_v22 }
0x14b4   :  { %v3099_v23 = vpop.eup %3098 }
0x14b5   :  { %v3101_v25 = vpop.eup %3100  ;;  %v1341_v31 = vmul.f32 %v3099_v23, %v1337_v29 }
0x14b6   :  { %v1342_v32 = vmul.f32 %v3101_v25, %v1338_v30 }
0x1518   :  { %v1346_v19 = vpop.permute.xlu0 %1345 }
0x1519   :  { %v1348_v26 = vpop.permute.xlu1 %1347  ;;  %v1351_v27 = vmul.f32 %v3099_v23, %v1346_v19 }
0x151a   :  { %v1352_v28 = vmul.f32 %v3101_v25, %v1348_v26 }
0x151b   :  { %1355 = vrot.lane.b32.xlu0 %v1351_v27, %s3357_s18 }
0x151c   :  { %1357 = vrot.lane.b32.xlu1 %v1352_v28, %s3357_s18 }
0x158d   :  { %v1356_v33 = vpop.permute.xlu0 %1355 }
0x158e   :  { %v1358_v35 = vpop.permute.xlu1 %1357  ;;  %v3696_v36 = vadd.f32 %v1356_v33, %v1341_v31 }
0x158f   :  { %v3698_v37 = vadd.f32 %v1358_v35, %v1342_v32 }
0x1590   :  { %3102 = vtanh.f32 %v3696_v36 }
0x1591   :  { %3104 = vtanh.f32 %v3698_v37 }
0x159a   :  { %v3103_v38 = vpop.eup %3102 }
0x159b   :  { %v3105_v39 = vpop.eup %3104  ;;  %1367 = vrot.lane.b32.xlu0 %v3103_v38, %s3357_s18 }
0x159c   :  { %1369 = vrot.lane.b32.xlu1 %v3105_v39, %s3357_s18 }
0x159f   :  { %640 = vrot.lane.b32.xlu0 %v3617_v15, %s3368_s5  ;;  %v1402_v15 = vld [vmem:[#allocation11 + $0x8] sm:$0xff] }
0x15a0   :  { %493 = vrot.lane.b32.xlu1 %v3597_v34, %s3368_s5  ;;  %v3715_v34 = vpack.c.bf16 %v1402_v15, %v1401_v44 }
0x15a2   :  { %2909 = vmatpush3.bf16.msra.mxu0 %v3715_v34 }
0x15a3   :  { %936 = vrot.lane.b32.xlu0 %v3654_v42, %s3368_s5  ;;  %v1403_v42 = vld [vmem:[#allocation11 + $0x10] sm:$0xff]  ;;  %2910 = vmatprep.subr.bf16.mxu0 %v3365_v0 }
0x15a4   :  { %788 = vrot.lane.b32.xlu1 %v3636_v58, %s3368_s5  ;;  %v3718_v58 = vpack.c.bf16 %v1404_v47, %v1403_v42 }
0x15a6   :  { %2912 = vmatpush3.bf16.msra.mxu0 %v3718_v58 }
0x15a7   :  { %1232 = vrot.lane.b32.xlu0 %v1231_v3, %s3368_s5  ;;  %2919 = vmatprep.subr.bf16.mxu0 %v3365_v0 }
0x15a8   :  { %1084 = vrot.lane.b32.xlu1 %v3673_v24, %s3368_s5 }
0x15a9   :  { %2757 = vmatmul.mubr.msk.f32.vlgmr.msra.gmra.mrb[10].mxu0 %vm210_vm2, %v1500_v50 }
0x15aa   :  { %2921 = vmatpush3.bf16.msra.mxu0 %v3715_v34  ;;  %2778 = vmatprep.mubr.msk.f32.mxu0 %vm3366_vm0, %v3367_v1 }
0x15ab   :  { %2922 = vmatprep.subr.bf16.mxu0 %v3365_v0 }
0x15ae   :  { %2924 = vmatpush3.bf16.msra.mxu0 %v3718_v58 }
0x15af   :  { %2931 = vmatprep.subr.bf16.mxu0 %v3365_v0 }
0x160d   :  { %v1368_v24 = vpop.permute.xlu0 %1367 }
0x160e   :  { %v1370_v49 = vpop.permute.xlu1 %1369  ;;  %v1373_v8 = vmul.f32 %v3099_v23, %v1368_v24 }
0x160f   :  { %v1374_v51 = vmul.f32 %v3101_v25, %v1370_v49 }
0x1610   :  { %1378 = vrot.lane.b32.xlu1 %v1373_v8, %s3368_s5 }
0x1611   :  { %v1377_v13 = vrot.slane %v1374_v51, 7  ;;  %v641_v52 = vpop.permute.xlu0 %640 }
0x1612   :  { %v494_v53 = vpop.permute.xlu1 %493  ;;  %644 = vst.msk [vmem:[#allocation2 + $0x2] sm:$0xc] %vm643_vm11, %v641_v52 }
0x1613   :  { %497 = vst.msk [vmem:[#allocation2 + $0x1] sm:$0x6] %vm496_vm12, %v494_v53  ;;  %1380 = vrot.lane.b32.xlu0 %v1377_v13, %s3368_s5 }
0x1615   :  { %v937_v55 = vpop.permute.xlu0 %936 }
0x1616   :  { %v789_v56 = vpop.permute.xlu1 %788  ;;  %940 = vst.msk [vmem:[#allocation2 + $0x4] sm:$0x30] %vm939_vm13, %v937_v55 }
0x1617   :  { %792 = vst.msk [vmem:[#allocation2 + $0x3] sm:$0x18] %vm791_vm14, %v789_v56  ;;  %1585 = vrot.lane.b32.xlu0 %v1502_v54, %s3357_s18 }
0x1619   :  { %v1233_v57 = vpop.permute.xlu0 %1232 }
0x161a   :  { %v1085_v59 = vpop.permute.xlu1 %1084  ;;  %1236 = vst.msk [vmem:[#allocation2 + $0x6] sm:$0xc0] %vm1235_vm15, %v1233_v57 }
0x161b   :  { %1088 = vst.msk [vmem:[#allocation2 + $0x5] sm:$0x60] %vm1087_vm1, %v1085_v59 }
0x161e   :  { %v1405_v60 = vld [vmem:[#allocation2] sm:$0xff] }
0x161f   :  { %2745 = vmatprep.mubr.msk.f32.mxu1 %vm210_vm2, %v1405_v60 }
0x167c   :  { %v1572_v2 = vpop.f32.mrb[10].mxu0 }
0x167d   :  { %v2758_v3 = vpop.f32.mrb[11].mxu0 }
0x1682   :  { %v1379_v61 = vpop.permute.xlu1 %1378 }
0x1683   :  { %1385 = vst.msk [vmem:[#allocation2 + $0x7] sm:$0x80] %vm1384_vm3, %v1379_v61  ;;  %1388 = vst.msk [vmem:[#allocation13 - $0x7] sm:$0x80] %vm1384_vm3, %v1379_v61 }
0x1685   :  { %v1381_v62 = vpop.permute.xlu0 %1380 }
0x1686   :  { %1387 = vst.msk [vmem:[#allocation2 + $0xf] sm:$0x1] %vm1386_vm4, %v1381_v62  ;;  %1389 = vst.msk [vmem:[#allocation13 + $0x1] sm:$0x1] %vm1386_vm4, %v1381_v62 }
0x1689   :  { %v1586_v21 = vpop.permute.xlu0 %1585 }
0x168d   :  { %v1406_v63 = vld [vmem:[#allocation2 + $0x8] sm:$0xff] }
0x168e   :  { %2746 = vmatmul.mubr.msk.f32.vlgmr.msra.gmra.mrb[8].mxu1 %vm210_vm2, %v1406_v63 }
0x168f   :  { %2915 = vmatpush3.bf16.msra.mxu1 %v3715_v34  ;;  %2767 = vmatprep.mubr.msk.f32.mxu1 %vm3366_vm0, %v3367_v1 }
0x1690   :  { %2916 = vmatprep.subr.bf16.mxu1 %v3365_v0 }
0x1693   :  { %2918 = vmatpush3.bf16.msra.mxu1 %v3718_v58 }
0x1694   :  { %2925 = vmatprep.subr.bf16.mxu1 %v3365_v0 }
0x1761   :  { %v2747_v5 = vpop.f32.mrb[8].mxu1 }
0x1762   :  { %v3750_v6 = vadd.f32 %v2747_v5, %v2526_v4  ;;  %v1490_v7 = vpop.f32.mrb[9].mxu1 }
0x1763   :  { %v3752_v9 = vadd.f32 %v2526_v4, %v1490_v7 }
0x1765   :  { %v1576_v10 = vadd.f32 %v1572_v2, %v3752_v9 }
0x1767   :  { %3106 = vtanh.f32 %v1576_v10  ;;  %v2530_v12 = vmul.f32 -1.442695, %v1576_v10 }
0x1769   :  { %3108 = vpow2.f32 %v2530_v12 }
0x1771   :  { %v3107_v11 = vpop.eup %3106 }
0x1772   :  { %1590 = vrot.lane.b32.xlu1 %v3107_v11, %s3357_s18 }
0x1773   :  { %v3109_v14 = vpop.eup %3108 }
0x1774   :  { %v1580_v16 = vadd.f32 1.0, %v3109_v14 }
0x1776   :  { %3110 = vrcp.f32 %v1580_v16 }
0x1780   :  { %v3111_v17 = vpop.eup %3110 }
0x1781   :  { %v1588_v22 = vmul.f32 %v3111_v17, %v1586_v21 }
0x17e4   :  { %v1591_v18 = vpop.permute.xlu1 %1590 }
0x17e5   :  { %v1593_v20 = vmul.f32 %v3111_v17, %v1591_v18 }
0x17e7   :  { %1595 = vrot.lane.b32.xlu1 %v1593_v20, %s3357_s18 }
0x1859   :  { %v1596_v23 = vpop.permute.xlu1 %1595 }
0x185a   :  { %v1598_v19 = vadd.f32 %v1596_v23, %v1588_v22 }
0x185c   :  { %3112 = vtanh.f32 %v1598_v19  ;;  %v1692_v44 = vrot.slane %v1598_v19, 6 }
0x1866   :  { %v3113_v25 = vpop.eup %3112 }
0x1867   :  { %1601 = vrot.lane.b32.xlu0 %v3113_v25, %s3357_s18 }
0x18d9   :  { %v1602_v26 = vpop.permute.xlu0 %1601 }
0x18da   :  { %v1604_v27 = vmul.f32 %v3111_v17, %v1602_v26 }
0x18dc   :  { %1606 = vrot.lane.b32.xlu1 %v1604_v27, %s3368_s5 }
0x194e   :  { %v1607_v28 = vpop.permute.xlu1 %1606 }
0x194f   :  { %2768 = vmatmul.mubr.msk.f32.vlgmr.msra.gmra.mrb[10].mxu1 %vm210_vm2, %v1607_v28 }
0x1950   :  { %2927 = vmatpush3.bf16.msra.mxu1 %v3715_v34  ;;  %2789 = vmatprep.mubr.msk.f32.mxu1 %vm3366_vm0, %v3367_v1 }
0x1951   :  { %2928 = vmatprep.subr.bf16.mxu1 %v3365_v0 }
0x1954   :  { %2930 = vmatpush3.bf16.msra.mxu1 %v3718_v58 }
0x1955   :  { %2937 = vmatprep.subr.bf16.mxu1 %v3365_v0 }
0x1a22   :  { %v1676_v29 = vpop.f32.mrb[10].mxu1 }
0x1a23   :  { %v1681_v30 = vrot.slane %v1676_v29, 6  ;;  %v2769_v31 = vpop.f32.mrb[11].mxu1 }
0x1a25   :  { %v1683_v32 = vadd.f32 %v1681_v30, %v3752_v9 }
0x1a27   :  { %3114 = vtanh.f32 %v1683_v32  ;;  %v2532_v35 = vmul.f32 -1.442695, %v1683_v32 }
0x1a29   :  { %3116 = vpow2.f32 %v2532_v35 }
0x1a31   :  { %v3115_v33 = vpop.eup %3114 }
0x1a32   :  { %1696 = vrot.lane.b32.xlu0 %v3115_v33, %s3357_s18 }
0x1a33   :  { %v3117_v38 = vpop.eup %3116 }
0x1a34   :  { %v1687_v39 = vadd.f32 1.0, %v3117_v38 }
0x1a36   :  { %3118 = vrcp.f32 %v1687_v39 }
0x1a40   :  { %v3119_v40 = vpop.eup %3118 }
0x1a41   :  { %v1694_v15 = vmul.f32 %v3119_v40, %v1692_v44 }
0x1aa4   :  { %v1697_v41 = vpop.permute.xlu0 %1696 }
0x1aa5   :  { %v1699_v43 = vmul.f32 %v3119_v40, %v1697_v41 }
0x1aa7   :  { %1701 = vrot.lane.b32.xlu1 %v1699_v43, %s3357_s18 }
0x1b19   :  { %v1702_v45 = vpop.permute.xlu1 %1701 }
0x1b1a   :  { %v1704_v46 = vadd.f32 %v1702_v45, %v1694_v15 }
0x1b1c   :  { %3120 = vtanh.f32 %v1704_v46  ;;  %v1799_v60 = vrot.slane %v1704_v46, 6 }
0x1b26   :  { %v3121_v42 = vpop.eup %3120 }
0x1b27   :  { %1707 = vrot.lane.b32.xlu0 %v3121_v42, %s3357_s18 }
0x1b99   :  { %v1708_v47 = vpop.permute.xlu0 %1707 }
0x1b9a   :  { %v1710_v48 = vmul.f32 %v3119_v40, %v1708_v47 }
0x1b9c   :  { %v1712_v24 = vrot.slane %v1710_v48, 2 }
0x1b9e   :  { %1713 = vrot.lane.b32.xlu1 %v1712_v24, %s3368_s5 }
0x1c10   :  { %v1714_v49 = vpop.permute.xlu1 %1713 }
0x1c11   :  { %2779 = vmatmul.mubr.msk.f32.vlgmr.msra.gmra.mrb[12].mxu0 %vm210_vm2, %v1714_v49 }
0x1c12   :  { %2933 = vmatpush3.bf16.msra.mxu0 %v3715_v34  ;;  %2800 = vmatprep.mubr.msk.f32.mxu0 %vm3366_vm0, %v3367_v1 }
0x1c13   :  { %2934 = vmatprep.subr.bf16.mxu0 %v3365_v0 }
0x1c16   :  { %2936 = vmatpush3.bf16.msra.mxu0 %v3718_v58 }
0x1c17   :  { %2943 = vmatprep.subr.bf16.mxu0 %v3365_v0 }
0x1ce4   :  { %v1783_v8 = vpop.f32.mrb[12].mxu0 }
0x1ce5   :  { %v1788_v50 = vrot.slane %v1783_v8, 4  ;;  %v2780_v51 = vpop.f32.mrb[13].mxu0 }
0x1ce7   :  { %v1790_v13 = vadd.f32 %v1788_v50, %v3752_v9 }
0x1ce9   :  { %3122 = vtanh.f32 %v1790_v13  ;;  %v2534_v53 = vmul.f32 -1.442695, %v1790_v13 }
0x1ceb   :  { %3124 = vpow2.f32 %v2534_v53 }
0x1cf3   :  { %v3123_v52 = vpop.eup %3122 }
0x1cf4   :  { %1803 = vrot.lane.b32.xlu0 %v3123_v52, %s3357_s18 }
0x1cf5   :  { %v3125_v54 = vpop.eup %3124 }
0x1cf6   :  { %v1794_v55 = vadd.f32 1.0, %v3125_v54 }
0x1cf8   :  { %3126 = vrcp.f32 %v1794_v55 }
0x1d02   :  { %v3127_v56 = vpop.eup %3126 }
0x1d03   :  { %v1801_v61 = vmul.f32 %v3127_v56, %v1799_v60 }
0x1d66   :  { %v1804_v57 = vpop.permute.xlu0 %1803 }
0x1d67   :  { %v1806_v59 = vmul.f32 %v3127_v56, %v1804_v57 }
0x1d69   :  { %1808 = vrot.lane.b32.xlu1 %v1806_v59, %s3357_s18 }
0x1ddb   :  { %v1809_v62 = vpop.permute.xlu1 %1808 }
0x1ddc   :  { %v1811_v63 = vadd.f32 %v1809_v62, %v1801_v61 }
0x1dde   :  { %3128 = vtanh.f32 %v1811_v63  ;;  %v1906_v19 = vrot.slane %v1811_v63, 6 }
0x1de8   :  { %v3129_v2 = vpop.eup %3128 }
0x1de9   :  { %1814 = vrot.lane.b32.xlu0 %v3129_v2, %s3357_s18 }
0x1e5b   :  { %v1815_v3 = vpop.permute.xlu0 %1814 }
0x1e5c   :  { %v1817_v4 = vmul.f32 %v3127_v56, %v1815_v3 }
0x1e5e   :  { %v1819_v5 = vrot.slane %v1817_v4, 4 }
0x1e60   :  { %1820 = vrot.lane.b32.xlu1 %v1819_v5, %s3368_s5 }
0x1ed2   :  { %v1821_v7 = vpop.permute.xlu1 %1820 }
0x1ed3   :  { %2790 = vmatmul.mubr.msk.f32.vlgmr.msra.gmra.mrb[12].mxu1 %vm210_vm2, %v1821_v7 }
0x1ed4   :  { %2939 = vmatpush3.bf16.msra.mxu1 %v3715_v34  ;;  %2811 = vmatprep.mubr.msk.f32.mxu1 %vm3366_vm0, %v3367_v1 }
0x1ed5   :  { %2940 = vmatprep.subr.bf16.mxu1 %v3365_v0 }
0x1ed8   :  { %2942 = vmatpush3.bf16.msra.mxu1 %v3718_v58 }
0x1ed9   :  { %2949 = vmatprep.subr.bf16.mxu1 %v3365_v0 }
0x1fa6   :  { %v1890_v10 = vpop.f32.mrb[12].mxu1 }
0x1fa7   :  { %v1895_v11 = vrot.slane %v1890_v10, 2  ;;  %v2791_v12 = vpop.f32.mrb[13].mxu1 }
0x1fa9   :  { %v1897_v14 = vadd.f32 %v1895_v11, %v3752_v9 }
0x1fab   :  { %3130 = vtanh.f32 %v1897_v14  ;;  %v2536_v17 = vmul.f32 -1.442695, %v1897_v14 }
0x1fad   :  { %3132 = vpow2.f32 %v2536_v17 }
0x1fb5   :  { %v3131_v16 = vpop.eup %3130 }
0x1fb6   :  { %1910 = vrot.lane.b32.xlu0 %v3131_v16, %s3357_s18 }
0x1fb7   :  { %v3133_v18 = vpop.eup %3132 }
0x1fb8   :  { %v1901_v20 = vadd.f32 1.0, %v3133_v18 }
0x1fba   :  { %3134 = vrcp.f32 %v1901_v20 }
0x1fc4   :  { %v3135_v21 = vpop.eup %3134 }
0x1fc5   :  { %v1908_v25 = vmul.f32 %v3135_v21, %v1906_v19 }
0x2028   :  { %v1911_v22 = vpop.permute.xlu0 %1910 }
0x2029   :  { %v1913_v23 = vmul.f32 %v3135_v21, %v1911_v22 }
0x202b   :  { %1915 = vrot.lane.b32.xlu1 %v1913_v23, %s3357_s18 }
0x209d   :  { %v1916_v26 = vpop.permute.xlu1 %1915 }
0x209e   :  { %v1918_v27 = vadd.f32 %v1916_v26, %v1908_v25 }
0x20a0   :  { %3136 = vtanh.f32 %v1918_v27  ;;  %v2010_v45 = vrot.slane %v1918_v27, 6 }
0x20aa   :  { %v3137_v9 = vpop.eup %3136 }
0x20ab   :  { %1921 = vrot.lane.b32.xlu0 %v3137_v9, %s3357_s18 }
0x211d   :  { %v1922_v28 = vpop.permute.xlu0 %1921 }
0x211e   :  { %v1924_v29 = vmul.f32 %v3135_v21, %v1922_v28 }
0x2120   :  { %v1926_v30 = vrot.slane %v1924_v29, 6 }
0x2122   :  { %1927 = vrot.lane.b32.xlu1 %v1926_v30, %s3368_s5 }
0x2194   :  { %v1928_v31 = vpop.permute.xlu1 %1927 }
0x2195   :  { %2801 = vmatmul.mubr.msk.f32.vlgmr.msra.gmra.mrb[14].mxu0 %vm210_vm2, %v1928_v31 }
0x2196   :  { %2945 = vmatpush3.bf16.msra.mxu0 %v3715_v34  ;;  %2822 = vmatprep.mubr.msk.f32.mxu0 %vm3366_vm0, %v3367_v1 }
0x2197   :  { %2946 = vmatprep.subr.bf16.mxu0 %v3365_v0 }
0x219a   :  { %2948 = vmatpush3.bf16.msra.mxu0 %v3718_v58 }
0x219b   :  { %2955 = vmatprep.subr.bf16.mxu0 %v3365_v0 }
0x2268   :  { %v1997_v32 = vpop.f32.mrb[14].mxu0 }
0x2269   :  { %v2001_v33 = vadd.f32 %v1997_v32, %v3750_v6  ;;  %v2802_v35 = vpop.f32.mrb[15].mxu0 }
0x226b   :  { %3138 = vtanh.f32 %v2001_v33  ;;  %v2538_v39 = vmul.f32 -1.442695, %v2001_v33 }
0x226d   :  { %3140 = vpow2.f32 %v2538_v39 }
0x2275   :  { %v3139_v38 = vpop.eup %3138 }
0x2276   :  { %2014 = vrot.lane.b32.xlu0 %v3139_v38, %s3357_s18 }
0x2277   :  { %v3141_v40 = vpop.eup %3140 }
0x2278   :  { %v2005_v41 = vadd.f32 1.0, %v3141_v40 }
0x227a   :  { %3142 = vrcp.f32 %v2005_v41 }
0x2284   :  { %v3143_v43 = vpop.eup %3142 }
0x2285   :  { %v2012_v46 = vmul.f32 %v3143_v43, %v2010_v45 }
0x22e8   :  { %v2015_v44 = vpop.permute.xlu0 %2014 }
0x22e9   :  { %v2017_v15 = vmul.f32 %v3143_v43, %v2015_v44 }
0x22eb   :  { %2019 = vrot.lane.b32.xlu1 %v2017_v15, %s3357_s18 }
0x235d   :  { %v2020_v42 = vpop.permute.xlu1 %2019 }
0x235e   :  { %v2022_v47 = vadd.f32 %v2020_v42, %v2012_v46 }
0x2360   :  { %3144 = vtanh.f32 %v2022_v47 }
0x236a   :  { %v3145_v48 = vpop.eup %3144 }
0x236b   :  { %2025 = vrot.lane.b32.xlu0 %v3145_v48, %s3357_s18  ;;  %v2363_v48 = vld [vmem:[%s3907_s9 + $0x8] sm:$0xff] }
0x23dd   :  { %v2026_v24 = vpop.permute.xlu0 %2025 }
0x23de   :  { %v2028_v49 = vmul.f32 %v3143_v43, %v2026_v24 }
0x23e0   :  { %2030 = vrot.lane.b32.xlu1 %v2028_v49, %s3368_s5  ;;  %v2364_v49 = vld [vmem:[%s3907_s9 + $0x10] sm:$0xff] }
0x2452   :  { %v2031_v8 = vpop.permute.xlu1 %2030 }
0x2453   :  { %2812 = vmatmul.mubr.msk.f32.vlgmr.msra.gmra.mrb[14].mxu1 %vm210_vm2, %v2031_v8  ;;  %v2365_v8 = vld [vmem:[%s3907_s9 + $0x18] sm:$0xff] }
0x2454   :  { %2951 = vmatpush3.bf16.msra.mxu1 %v3715_v34  ;;  %2833 = vmatprep.mubr.msk.f32.mxu1 %vm3366_vm0, %v3367_v1 }
0x2455   :  { %2952 = vmatprep.subr.bf16.mxu1 %v3365_v0 }
0x2458   :  { %2954 = vmatpush3.bf16.msra.mxu1 %v3718_v58  ;;  %v2116_v58 = vrot.slane %v2022_v47, 6  ;;  %v2362_v47 = vld [vmem:[%s3907_s9] sm:$0xff]  ;;  %s3370_s9 = smov [#allocation13]  }
0x2459   :  { %v2956_v24 = vpack.c.bf16 %v2363_v48, %v2362_v47  ;;  %s2466_s7 = sshll.u32 %s3370_s9, 4  ;;  %s2467_s7 = int_to_ptr.vmem [resolvable:$true] %s2466_s7 }
0x245a   :  { %s3280_s26 = scalar_lea.vmem %s2467_s7, 64  ;;  %p3285_p13 = scmp.lt.s32.totalorder %s2467_s7, %s2467_s7 }
0x245b   :  { %p3281_p12 = scmp.ne.s32.totalorder %s2467_s7, %s3280_s26  ;;  %p3286_p0 = scmp.lt.s32.totalorder %s3280_s26, %s3280_s26 }
0x245d   :  { %p3287_p1 = por %p3286_p0, %p3285_p13 }
0x245f   :  { %p3288_p2 = pnand %p3287_p1, %p3281_p12 }
0x2526   :  { %v2100_v50 = vpop.f32.mrb[14].mxu1 }
0x2527   :  { %v2105_v51 = vrot.slane %v2100_v50, 6  ;;  %v2813_v13 = vpop.f32.mrb[15].mxu1  ;;  %v2959_v50 = vpack.c.bf16 %v2365_v8, %v2364_v49 }
0x2529   :  { %v2107_v52 = vadd.f32 %v2105_v51, %v3750_v6 }
0x252b   :  { %3146 = vtanh.f32 %v2107_v52  ;;  %v2540_v54 = vmul.f32 -1.442695, %v2107_v52 }
0x252d   :  { %3148 = vpow2.f32 %v2540_v54 }
0x2535   :  { %v3147_v53 = vpop.eup %3146 }
0x2536   :  { %2120 = vrot.lane.b32.xlu0 %v3147_v53, %s3357_s18  ;;  %v1392_v53 = vrot.slane %v3698_v37, 7 }
0x2537   :  { %v3149_v55 = vpop.eup %3148 }
0x2538   :  { %v2111_v34 = vadd.f32 1.0, %v3149_v55 }
0x253a   :  { %3150 = vrcp.f32 %v2111_v34 }
0x2544   :  { %v3151_v56 = vpop.eup %3150 }
0x2545   :  { %v2118_v60 = vmul.f32 %v3151_v56, %v2116_v58 }
0x25a8   :  { %v2121_v57 = vpop.permute.xlu0 %2120 }
0x25a9   :  { %v2123_v59 = vmul.f32 %v3151_v56, %v2121_v57 }
0x25ab   :  { %2125 = vrot.lane.b32.xlu1 %v2123_v59, %s3357_s18 }
0x261d   :  { %v2126_v61 = vpop.permute.xlu1 %2125 }
0x261e   :  { %v2128_v62 = vadd.f32 %v2126_v61, %v2118_v60 }
0x2620   :  { %3152 = vtanh.f32 %v2128_v62 }
0x262a   :  { %v3153_v63 = vpop.eup %3152 }
0x262b   :  { %2131 = vrot.lane.b32.xlu0 %v3153_v63, %s3357_s18 }
0x269d   :  { %v2132_v2 = vpop.permute.xlu0 %2131 }
0x269e   :  { %v2134_v3 = vmul.f32 %v3151_v56, %v2132_v2 }
0x26a0   :  { %v2136_v4 = vrot.slane %v2134_v3, 2 }
0x26a2   :  { %2137 = vrot.lane.b32.xlu1 %v2136_v4, %s3368_s5 }
0x2714   :  { %v2138_v5 = vpop.permute.xlu1 %2137 }
0x2715   :  { %2823 = vmatmul.mubr.msk.f32.vlgmr.msra.gmra.mrb[16].mxu0 %vm210_vm2, %v2138_v5 }
0x2716   :  { %2844 = vmatprep.mubr.msk.f32.mxu0 %vm3366_vm0, %v3367_v1  ;;  %v2223_v1 = vrot.slane %v2128_v62, 6  ;;  %2957 = vmatpush3.bf16.msra.mxu0 %v2956_v24 }
0x2717   :  { %2958 = vmatprep.subr.bf16.mxu0 %v3365_v0 }
0x271a   :  { %2960 = vmatpush3.bf16.msra.mxu0 %v2959_v50 }
0x27e8   :  { %v2207_v7 = vpop.f32.mrb[16].mxu0 }
0x27e9   :  { %v2212_v10 = vrot.slane %v2207_v7, 4  ;;  %v2824_v11 = vpop.f32.mrb[17].mxu0 }
0x27eb   :  { %v2214_v12 = vadd.f32 %v2212_v10, %v3750_v6 }
0x27ed   :  { %3154 = vtanh.f32 %v2214_v12  ;;  %v2542_v16 = vmul.f32 -1.442695, %v2214_v12 }
0x27ef   :  { %3156 = vpow2.f32 %v2542_v16 }
0x27f7   :  { %v3155_v14 = vpop.eup %3154 }
0x27f8   :  { %2227 = vrot.lane.b32.xlu0 %v3155_v14, %s3357_s18 }
0x27f9   :  { %v3157_v17 = vpop.eup %3156 }
0x27fa   :  { %v2218_v18 = vadd.f32 1.0, %v3157_v17 }
0x27fc   :  { %3158 = vrcp.f32 %v2218_v18 }
0x2806   :  { %v3159_v20 = vpop.eup %3158 }
0x2807   :  { %v2225_v23 = vmul.f32 %v3159_v20, %v2223_v1 }
0x286a   :  { %v2228_v21 = vpop.permute.xlu0 %2227 }
0x286b   :  { %v2230_v22 = vmul.f32 %v3159_v20, %v2228_v21 }
0x286d   :  { %2232 = vrot.lane.b32.xlu1 %v2230_v22, %s3357_s18 }
0x28df   :  { %v2233_v19 = vpop.permute.xlu1 %2232 }
0x28e0   :  { %v2235_v25 = vadd.f32 %v2233_v19, %v2225_v23 }
0x28e2   :  { %3160 = vtanh.f32 %v2235_v25  ;;  %v2330_v15 = vrot.slane %v2235_v25, 6 }
0x28ec   :  { %v3161_v26 = vpop.eup %3160 }
0x28ed   :  { %2238 = vrot.lane.b32.xlu0 %v3161_v26, %s3357_s18 }
0x295f   :  { %v2239_v27 = vpop.permute.xlu0 %2238 }
0x2960   :  { %v2241_v9 = vmul.f32 %v3159_v20, %v2239_v27 }
0x2962   :  { %v2243_v28 = vrot.slane %v2241_v9, 4 }
0x2964   :  { %2244 = vrot.lane.b32.xlu1 %v2243_v28, %s3368_s5 }
0x29d6   :  { %v2245_v29 = vpop.permute.xlu1 %2244 }
0x29d7   :  { %2834 = vmatmul.mubr.msk.f32.vlgmr.msra.gmra.mrb[16].mxu1 %vm210_vm2, %v2245_v29 }
0x2aaa   :  { %v2314_v30 = vpop.f32.mrb[16].mxu1 }
0x2aab   :  { %v2319_v31 = vrot.slane %v2314_v30, 2  ;;  %v2835_v32 = vpop.f32.mrb[17].mxu1 }
0x2aad   :  { %v2321_v33 = vadd.f32 %v2319_v31, %v3750_v6 }
0x2aaf   :  { %3162 = vtanh.f32 %v2321_v33  ;;  %v2544_v38 = vmul.f32 -1.442695, %v2321_v33 }
0x2ab1   :  { %3164 = vpow2.f32 %v2544_v38 }
0x2ab9   :  { %v3163_v35 = vpop.eup %3162 }
0x2aba   :  { %2334 = vrot.lane.b32.xlu0 %v3163_v35, %s3357_s18 }
0x2abb   :  { %v3165_v39 = vpop.eup %3164 }
0x2abc   :  { %v2325_v40 = vadd.f32 1.0, %v3165_v39 }
0x2abe   :  { %3166 = vrcp.f32 %v2325_v40 }
0x2ac8   :  { %v3167_v41 = vpop.eup %3166 }
0x2ac9   :  { %v2332_v45 = vmul.f32 %v3167_v41, %v2330_v15 }
0x2b2c   :  { %v2335_v43 = vpop.permute.xlu0 %2334 }
0x2b2d   :  { %v2337_v44 = vmul.f32 %v3167_v41, %v2335_v43 }
0x2b2f   :  { %2339 = vrot.lane.b32.xlu1 %v2337_v44, %s3357_s18 }
0x2ba1   :  { %v2340_v46 = vpop.permute.xlu1 %2339 }
0x2ba2   :  { %v2342_v42 = vadd.f32 %v2340_v46, %v2332_v45 }
0x2ba4   :  { %3168 = vtanh.f32 %v2342_v42 }
0x2bae   :  { %v3169_v6 = vpop.eup %3168 }
0x2baf   :  { %2345 = vrot.lane.b32.xlu0 %v3169_v6, %s3357_s18 }
0x2c21   :  { %v2346_v51 = vpop.permute.xlu0 %2345 }
0x2c22   :  { %v2348_v13 = vmul.f32 %v3167_v41, %v2346_v51 }
0x2c24   :  { %v2361_v52 = vmax.f32 %v2348_v13, 0.0  ;;  %2350 = vrot.lane.b32.xlu0 %v2348_v13, %s3368_s5 }
0x2c26   :  { %v2374_v54 = vrot.slane %v2361_v52, 6 }
0x2c28   :  { %1395 = vrot.lane.b32.xlu0 %v1392_v53, %s3369_s30  ;;  %2375 = vrot.lane.b32.xlu1 %v2374_v54, %s3368_s5 }
0x2c2c   :  { %1393 = vrot.lane.b32.xlu1 %v3696_v36, %s3369_s30 }
0x2c30   :  { %2356 = vrot.lane.b32.xlu1 %v2342_v42, %s3369_s30 }
0x2c96   :  { %v2351_v0 = vpop.permute.xlu0 %2350 }
0x2c97   :  { %2354 = vst.msk [vmem:[#allocation13 - $0x4] sm:$0xc0] %vm1235_vm15, %v2351_v0 }
0x2c9a   :  { %v1396_v55 = vpop.permute.xlu0 %1395  ;;  %v2376_v34 = vpop.permute.xlu1 %2375 }
0x2c9b   :  { %1400 = vst.msk [vmem:[#allocation15 + $0x1] sm:$0x1] %vm1386_vm4, %v1396_v55  ;;  %2845 = vmatmul.mubr.msk.f32.vlgmr.msra.gmra.mrb[18].mxu0 %vm210_vm2, %v2376_v34 }
0x2c9e   :  { %v1394_v56 = vpop.permute.xlu1 %1393 }
0x2c9f   :  { %1399 = vst.msk [vmem:[#allocation15 - $0x7] sm:$0x80] %vm1384_vm3, %v1394_v56 }
0x2ca2   :  { %v2357_v37 = vpop.permute.xlu1 %2356 }
0x2ca3   :  { %2360 = vst.msk [vmem:[#allocation15 - $0x4] sm:$0xc0] %vm1235_vm15, %v2357_v37 }
0x2ca4   :  { %3291 = shalt.err (!%p3288_p2)
}
0x2ca5   :  { %s3292_s14 = scalar_lea.hbm %s3910_s12, 64 }
0x2ca6   :  { %p3293_p3 = scmp.ne.s32.totalorder %s3910_s12, %s3292_s14  ;;  %p3296_p4 = scmp.lt.u32.totalorder %s3292_s14, %s3910_s12 }
0x2ca8   :  { %p3298_p5 = pnand %p3296_p4, %p3293_p3 }
0x2caa   :  { %3301 = shalt.err (!%p3298_p5)
}
0x2cab   :  { %2472 = dma.vmem_to_hbm [thread:$0]  %s2467_s7, 64, %s3910_s12, [#allocation14], %s3357_s18, %s3357_s18, %s3358_s19  }
0x2cac   :  { %s3371_s4 = smov [#allocation15]  }
0x2cad   :  { %s2478_s5 = sshll.u32 %s3371_s4, 4  ;;  %s2479_s5 = int_to_ptr.vmem [resolvable:$true] %s2478_s5 }
0x2cae   :  { %s3302_s16 = scalar_lea.vmem %s2479_s5, 64  ;;  %p3307_p7 = scmp.lt.s32.totalorder %s2479_s5, %s2479_s5 }
0x2caf   :  { %p3303_p6 = scmp.ne.s32.totalorder %s2479_s5, %s3302_s16  ;;  %p3308_p8 = scmp.lt.s32.totalorder %s3302_s16, %s3302_s16 }
0x2cb1   :  { %p3309_p9 = por %p3308_p8, %p3307_p7 }
0x2cb3   :  { %p3310_p10 = pnand %p3309_p9, %p3303_p6 }
0x2cb5   :  { %3313 = shalt.err (!%p3310_p10)
}
0x2cb6   :  { %s3314_s22 = scalar_lea.hbm %s3911_s13, 64 }
0x2cb7   :  { %p3315_p11 = scmp.ne.s32.totalorder %s3911_s13, %s3314_s22  ;;  %p3318_p12 = scmp.lt.u32.totalorder %s3314_s22, %s3911_s13 }
0x2cb9   :  { %p3320_p13 = pnand %p3318_p12, %p3315_p11 }
0x2cbb   :  { %3323 = shalt.err (!%p3320_p13)
}
0x2cbc   :  { %2484 = dma.vmem_to_hbm [thread:$0]  %s2479_s5, 64, %s3911_s13, [#allocation14], %s3357_s18, %s3357_s18, %s3358_s19   ;;  %vm2449_vm0 = vcmask 25600  }
0x2cbd   :  { %v2545_v36 = vld [vmem:[%s3908_s10] ss:$0 sm:$0xff]  ;;  %s3372_s9 = smov [#allocation12]  }
0x2cbe   :  { %s2457_s7 = sshll.u32 %s3372_s9, 4  ;;  %s2458_s7 = int_to_ptr.vmem [resolvable:$true] %s2457_s7 }
0x2cbf   :  { %s3324_s26 = scalar_lea.vmem %s2458_s7, 32  ;;  %p3329_p1 = scmp.lt.s32.totalorder %s2458_s7, %s2458_s7 }
0x2cc0   :  { %p3325_p0 = scmp.ne.s32.totalorder %s2458_s7, %s3324_s26  ;;  %p3330_p2 = scmp.lt.s32.totalorder %s3324_s26, %s3324_s26 }
0x2cc2   :  { %p3331_p3 = por %p3330_p2, %p3329_p1 }
0x2cc4   :  { %p3332_p4 = pnand %p3331_p3, %p3325_p0 }
0x2d6e   :  { %v2445_v57 = vpop.f32.mrb[18].mxu0 }
0x2d6f   :  { %v2446_v59 = vadd.f32 %v2545_v36, %v2445_v57  ;;  %v2846_v58 = vpop.f32.mrb[19].mxu0 }
0x2d71   :  { %2450 = vst.msk [vmem:[#allocation12] sm:$0x3] %vm2449_vm0, %v2446_v59 }
0x2d72   :  { %3335 = shalt.err (!%p3332_p4)
}
0x2d73   :  { %s3336_s19 = scalar_lea.hbm %s3909_s11, 32 }
0x2d74   :  { %p3337_p5 = scmp.ne.s32.totalorder %s3909_s11, %s3336_s19  ;;  %p3340_p6 = scmp.lt.u32.totalorder %s3336_s19, %s3909_s11 }
0x2d76   :  { %p3342_p7 = pnand %p3340_p6, %p3337_p5 }
0x2d78   :  { %3345 = shalt.err (!%p3342_p7)
}
0x2d79   :  { %2460 = dma.vmem_to_hbm [thread:$0]  %s2458_s7, 32, %s3909_s11, [#allocation5]  }
0x2d7a   :  { %3352 = dma.done.wait [#allocation5], 32  }
0x2d7b   :  { %3353 = vsyncadd [#allocation5], 4294967264 }
0x2d7c   :  { %3354 = dma.done.wait [#allocation14], 128  }
0x2d7d   :  { %3355 = vsyncadd [#allocation14], 4294967168 }
0x2d7e   :  { %2494 = vsyncpa [#allocation4], 1 }
0x2d7f   :  { %2495 = vsyncpa [#allocation7], 1 }
0x2d80   :  { %2496 = vsyncpa [#allocation10], 1 }
0x2d81   :  { %2497 = vsyncpa [#allocation5], 1 }
0x2d82   :  { %2498 = vsyncpa [#allocation14], 1 }

</bundles_post_ra>
